<compile_context>
chip_gen: v7x
topology: tpu7x:2x2x1
jax: 0.10.0
libtpu: 0.0.40
codegen_flags: <defaults>
</compile_context>

<pallas_src>
import numpy as np
import jax
import jax.numpy as jnp
from jax import lax
from jax.experimental import pallas as pl
from jax.experimental.pallas import tpu as pltpu


def _round_up(x, m):
    return ((x + m - 1) // m) * m


def rw_kernel(params_ref, oh_upd_ref, reward_ref, bonus_ref, out_ref):
    """Sequential RW +/- value recursion; emits logits = beta_temp * values + bonus.

    params_ref (SMEM, (4,) f32): [initial_value, alpha_plus, alpha_minus, beta_temp]
    oh_upd_ref (VMEM, (T, A, Nb) f32): one-hot(choice_for_updating) * ~isnan(reward)
    reward_ref (VMEM, (T, Nb) f32): reward with nan -> 0
    bonus_ref  (VMEM, (T, A, Nb) f32): beta_stick*stick + beta_info*cumsum (precomputed)
    out_ref    (VMEM, (T, A, Nb) f32): logits
    """
    init_val = params_ref[0]
    alpha_plus = params_ref[1]
    alpha_minus = params_ref[2]
    beta_temp = params_ref[3]

    T, A, Nb = out_ref.shape

    # t = 0: values are the initial values; bonus[0] is all-zero by construction.
    vals0 = jnp.full((1, A, Nb), init_val, dtype=jnp.float32)
    out_ref[0:1, :, :] = beta_temp * vals0 + bonus_ref[0:1, :, :]

    def body(t, vals):                                          # vals: (1, A, Nb) in vregs
        oh = oh_upd_ref[pl.ds(t, 1), :, :]                      # (1, A, Nb)
        rew = reward_ref[pl.ds(t, 1), :]                        # (1, Nb), nan already zeroed
        chosen = jnp.sum(vals * oh, axis=1, keepdims=True)      # (1, 1, Nb) sublane reduce
        pe = rew[:, None, :] - chosen                           # (1, 1, Nb)
        alpha = jnp.where(pe >= 0.0, alpha_plus, alpha_minus)   # +/- learning rates
        new_vals = vals + oh * (alpha * pe)                     # masked oh => no update on nan
        out_ref[pl.ds(t + 1, 1), :, :] = (
            beta_temp * new_vals + bonus_ref[pl.ds(t + 1, 1), :, :])
        return new_vals

    unroll = True if (T - 1) <= 32 else 8
    lax.fori_loop(0, T - 1, body, vals0, unroll=unroll)


def rescorla_wagner_forward(params, data, num_options, block_n=512):
    """JAX wrapper equivalent to RescorlaWagnerModel.forward -> logits (N, T, A)."""
    choice = data['choice'].astype(jnp.int32)                    # (N, T), may contain -100
    choice_upd = data['choice_for_updating'].astype(jnp.int32)   # (N, T), >= 0
    reward = data['reward'].astype(jnp.float32)                  # (N, T), may contain nan

    N, T = choice.shape
    A = num_options

    # --- scalar parameter transforms (glue) ---
    init_val = 100.0 * jnp.tanh(params['initial_values'])
    alpha_plus = jax.nn.sigmoid(params['alpha_plus'])
    alpha_minus = jax.nn.sigmoid(params['alpha_minus'])
    params_vec = jnp.stack(
        [init_val, alpha_plus, alpha_minus, params['beta_temp']]).astype(jnp.float32)

    # --- task-on-lane layout: (T, A, N) / (T, N), N padded to a lane-dense block ---
    n_b = min(_round_up(block_n, 128), _round_up(N, 128))
    N_pad = _round_up(N, n_b)
    num_blocks = N_pad // n_b
    pad = N_pad - N

    choice_tn = choice.T                                         # (T, N)
    choice_upd_tn = choice_upd.T                                 # (T, N)
    reward_tn = reward.T                                         # (T, N)
    valid_tn = jnp.logical_not(jnp.isnan(reward_tn))

    opt = jnp.arange(A, dtype=jnp.int32)
    # one-hot of choice_for_updating, masked so nan-reward trials produce no update
    oh_upd = (choice_upd_tn[:, None, :] == opt[None, :, None]).astype(jnp.float32)
    oh_upd = oh_upd * valid_tn[:, None, :].astype(jnp.float32)   # (T, A, N)
    rew_clean = jnp.where(valid_tn, reward_tn, 0.0).astype(jnp.float32)

    # stickiness / information-bonus prefix sums, hoisted out of the serial recursion
    oh_choice = (choice_tn[:, None, :] == opt[None, :, None]).astype(jnp.float32)
    stick = jnp.concatenate(
        [jnp.zeros((1, A, N), jnp.float32), oh_choice[:-1]], axis=0)   # prev-trial one-hot
    cum = jnp.cumsum(stick, axis=0)                                    # counts up to t-1
    bonus = (params['beta_stick'] * stick + params['beta_info'] * cum).astype(jnp.float32)

    if pad:
        oh_upd = jnp.pad(oh_upd, ((0, 0), (0, 0), (0, pad)))
        bonus = jnp.pad(bonus, ((0, 0), (0, 0), (0, pad)))
        rew_clean = jnp.pad(rew_clean, ((0, 0), (0, pad)))

    # VMEM budget estimate (double-buffered blocks + headroom); keep under v7x's 64 MiB/TC.
    block3d = T * _round_up(A, 8) * n_b * 4
    block2d = _round_up(T, 8) * n_b * 4
    vmem_bytes = 3 * (3 * block3d + block2d) + (4 << 20)
    vmem_bytes = int(min(max(vmem_bytes, 32 << 20), 64 << 20))

    out_tan = pl.pallas_call(
        rw_kernel,
        out_shape=jax.ShapeDtypeStruct((T, A, N_pad), jnp.float32),
        grid=(num_blocks,),
        in_specs=[
            pl.BlockSpec(memory_space=pltpu.MemorySpace.SMEM),   # params (whole, scalar)
            pl.BlockSpec((T, A, n_b), lambda i: (0, 0, i)),      # masked one-hot (updating)
            pl.BlockSpec((T, n_b), lambda i: (0, i)),            # cleaned reward
            pl.BlockSpec((T, A, n_b), lambda i: (0, 0, i)),      # precomputed bonus
        ],
        out_specs=pl.BlockSpec((T, A, n_b), lambda i: (0, 0, i)),
        compiler_params=pltpu.CompilerParams(
            dimension_semantics=("parallel",),
            vmem_limit_bytes=vmem_bytes),
    )(params_vec, oh_upd, rew_clean, bonus)

    # back to the PyTorch output convention (N, T, A)
    return jnp.transpose(out_tan[:, :, :N], (2, 0, 1))


def reference_forward(raw, choice, choice_upd, reward, num_options):
    """Pure numpy re-implementation of the PyTorch forward, for verification."""
    choice = np.asarray(choice)
    choice_upd = np.asarray(choice_upd)
    reward = np.asarray(reward, dtype=np.float32)
    N, T = choice.shape
    A = num_options

    init_val = 100.0 * np.tanh(raw['initial_values'])
    ap = 1.0 / (1.0 + np.exp(-raw['alpha_plus']))
    am = 1.0 / (1.0 + np.exp(-raw['alpha_minus']))

    values = np.full((N, T, A), init_val, dtype=np.float32)
    for t in range(T - 1):
        values[:, t + 1, :] = values[:, t, :]
        chosen = values[np.arange(N), t, choice_upd[:, t]]
        pe = reward[:, t] - chosen
        pe[np.isnan(reward[:, t])] = 0.0
        upd = ap * pe * (pe >= 0).astype(np.float32) + am * pe * (pe < 0).astype(np.float32)
        values[np.arange(N), t + 1, choice_upd[:, t]] = chosen + upd

    onehot_prev = np.stack([(choice[:, :-1] == a).astype(np.float32) for a in range(A)], axis=-1)
    stick = np.concatenate([np.zeros((N, 1, A), np.float32), onehot_prev], axis=1)
    cum = np.concatenate([np.zeros((N, 1, A), np.float32),
                          np.cumsum(onehot_prev, axis=1)], axis=1)
    return (raw['beta_temp'] * values + raw['beta_stick'] * stick + raw['beta_info'] * cum)


if __name__ == "__main__":
    N, T, A = 8, 16, 4  # tasks, trials, options

    key = jax.random.PRNGKey(0)
    keys = jax.random.split(key, 8)

    # Deterministic parameter init, mimicking 0.01 * randn([]) in __init__.
    params = {
        'alpha_plus': 0.01 * jax.random.normal(keys[0], ()),
        'alpha_minus': 0.01 * jax.random.normal(keys[1], ()),
        'initial_values': 0.01 * jax.random.normal(keys[2], ()),
        'beta_temp': 0.01 * jax.random.normal(keys[3], ()),
        'beta_info': 0.01 * jax.random.normal(keys[4], ()),
        'beta_stick': 0.01 * jax.random.normal(keys[5], ()),
    }

    choice = jax.random.randint(keys[6], (N, T), 0, A).astype(jnp.int32)
    reward = jax.random.normal(keys[7], (N, T), dtype=jnp.float32)
    # Exercise ignore_index and nan-reward paths.
    choice = choice.at[0, 3].set(-100)
    reward = reward.at[1, 5].set(jnp.nan)
    choice_for_updating = jnp.clip(choice, 0, None)

    data = {
        'choice': choice,
        'choice_for_updating': choice_for_updating,
        'reward': reward,
    }

    out = rescorla_wagner_forward(params, data, A)
    out = jax.block_until_ready(out)

    raw_np = {k: float(v) for k, v in params.items()}
    ref = reference_forward(raw_np, choice, choice_for_updating, reward, A)
    assert out.shape == (N, T, A)
    np.testing.assert_allclose(np.asarray(out), ref, rtol=1e-4, atol=1e-4)

    print("KERNEL_OK")
</pallas_src>

<mosaic_0001>
module attributes {stable_mosaic.version = 11 : i64} {
  func.func @rw_kernel(%arg0: i32, %arg1: memref<4xf32, #tpu.memory_space<smem>>, %arg2: memref<16x4x128xf32, #tpu.memory_space<vmem>>, %arg3: memref<16x128xf32, #tpu.memory_space<vmem>>, %arg4: memref<16x4x128xf32, #tpu.memory_space<vmem>>, %arg5: memref<16x4x128xf32, #tpu.memory_space<vmem>>) attributes {dimension_semantics = [#tpu.dimension_semantics<parallel>], iteration_bounds = array<i64: 1>, scalar_prefetch = 0 : i64, scratch_operands = 0 : i64, tpu.core_type = #tpu.core_type<tc>, window_params = [{transform_indices = @transform_0, window_bounds = array<i64: 4>}, {transform_indices = @transform_1, window_bounds = array<i64: 16, 4, 128>}, {transform_indices = @transform_2, window_bounds = array<i64: 16, 128>}, {transform_indices = @transform_3, window_bounds = array<i64: 16, 4, 128>}, {transform_indices = @transform_4, window_bounds = array<i64: 16, 4, 128>}]} {
    %c0 = arith.constant 0 : index
    %0 = memref.load %arg1[%c0] : memref<4xf32, #tpu.memory_space<smem>>
    %c1 = arith.constant 1 : index
    %1 = memref.load %arg1[%c1] : memref<4xf32, #tpu.memory_space<smem>>
    %c2 = arith.constant 2 : index
    %2 = memref.load %arg1[%c2] : memref<4xf32, #tpu.memory_space<smem>>
    %c3 = arith.constant 3 : index
    %3 = memref.load %arg1[%c3] : memref<4xf32, #tpu.memory_space<smem>>
    %4 = vector.broadcast %0 : f32 to vector<1x4x128xf32>
    %5 = vector.broadcast %3 : f32 to vector<1x4x128xf32>
    %6 = arith.mulf %5, %4 : vector<1x4x128xf32>
    %c0_0 = arith.constant 0 : index
    %c0_1 = arith.constant 0 : index
    %c0_2 = arith.constant 0 : index
    %7 = vector.load %arg4[%c0_0, %c0_1, %c0_2] : memref<16x4x128xf32, #tpu.memory_space<vmem>>, vector<1x4x128xf32>
    %8 = arith.addf %6, %7 : vector<1x4x128xf32>
    %c0_3 = arith.constant 0 : index
    %c0_4 = arith.constant 0 : index
    %c0_5 = arith.constant 0 : index
    %9 = vector.load %arg5[%c0_3, %c0_4, %c0_5] : memref<16x4x128xf32, #tpu.memory_space<vmem>>, vector<1x4x128xf32>
    tpu.vector_store %arg5[%c0_3, %c0_4, %c0_5], %8 {strides = array<i32>} : memref<16x4x128xf32, #tpu.memory_space<vmem>>, vector<1x4x128xf32>,
    %c0_i32 = arith.constant 0 : i32
    %10 = arith.index_cast %c0_i32 : i32 to index
    %c0_6 = arith.constant 0 : index
    %c0_7 = arith.constant 0 : index
    %11 = vector.load %arg2[%10, %c0_6, %c0_7] : memref<16x4x128xf32, #tpu.memory_space<vmem>>, vector<1x4x128xf32>
    %12 = arith.index_cast %c0_i32 : i32 to index
    %c0_8 = arith.constant 0 : index
    %13 = vector.load %arg3[%12, %c0_8] : memref<16x128xf32, #tpu.memory_space<vmem>>, vector<1x128xf32>
    %14 = arith.mulf %4, %11 : vector<1x4x128xf32>
    %cst = arith.constant dense<0.000000e+00> : vector<1x128xf32>
    %15 = vector.multi_reduction <add>, %14, %cst [1] : vector<1x4x128xf32> to vector<1x128xf32>
    %16 = vector.shape_cast %15 : vector<1x128xf32> to vector<1x1x128xf32>
    %17 = vector.shape_cast %13 : vector<1x128xf32> to vector<1x1x128xf32>
    %18 = arith.subf %17, %16 : vector<1x1x128xf32>
    %cst_9 = arith.constant 0.000000e+00 : f32
    %19 = vector.broadcast %cst_9 : f32 to vector<1x1x128xf32>
    %20 = arith.cmpf oge, %18, %19 : vector<1x1x128xf32>
    %21 = vector.broadcast %1 : f32 to vector<1x1x128xf32>
    %22 = vector.broadcast %2 : f32 to vector<1x1x128xf32>
    %23 = arith.select %20, %21, %22 : vector<1x1x128xi1>, vector<1x1x128xf32>
    %24 = arith.mulf %23, %18 : vector<1x1x128xf32>
    %25 = vector.broadcast %24 : vector<1x1x128xf32> to vector<1x4x128xf32>
    %26 = arith.mulf %11, %25 : vector<1x4x128xf32>
    %27 = arith.addf %4, %26 : vector<1x4x128xf32>
    %28 = vector.broadcast %3 : f32 to vector<1x4x128xf32>
    %29 = arith.mulf %28, %27 : vector<1x4x128xf32>
    %c1_i32 = arith.constant 1 : i32
    %30 = arith.addi %c0_i32, %c1_i32 : i32
    %31 = arith.index_cast %30 : i32 to index
    %c0_10 = arith.constant 0 : index
    %c0_11 = arith.constant 0 : index
    %32 = vector.load %arg4[%31, %c0_10, %c0_11] : memref<16x4x128xf32, #tpu.memory_space<vmem>>, vector<1x4x128xf32>
    %33 = arith.addf %29, %32 : vector<1x4x128xf32>
    %c1_i32_12 = arith.constant 1 : i32
    %34 = arith.addi %c0_i32, %c1_i32_12 : i32
    %35 = arith.index_cast %34 : i32 to index
    %c0_13 = arith.constant 0 : index
    %c0_14 = arith.constant 0 : index
    %36 = vector.load %arg5[%35, %c0_13, %c0_14] : memref<16x4x128xf32, #tpu.memory_space<vmem>>, vector<1x4x128xf32>
    tpu.vector_store %arg5[%35, %c0_13, %c0_14], %33 {strides = array<i32>} : memref<16x4x128xf32, #tpu.memory_space<vmem>>, vector<1x4x128xf32>,
    %c1_i32_15 = arith.constant 1 : i32
    %37 = arith.index_cast %c1_i32_15 : i32 to index
    %c0_16 = arith.constant 0 : index
    %c0_17 = arith.constant 0 : index
    %38 = vector.load %arg2[%37, %c0_16, %c0_17] : memref<16x4x128xf32, #tpu.memory_space<vmem>>, vector<1x4x128xf32>
    %39 = arith.index_cast %c1_i32_15 : i32 to index
    %c0_18 = arith.constant 0 : index
    %40 = vector.load %arg3[%39, %c0_18] : memref<16x128xf32, #tpu.memory_space<vmem>>, vector<1x128xf32>
    %41 = arith.mulf %27, %38 : vector<1x4x128xf32>
    %cst_19 = arith.constant dense<0.000000e+00> : vector<1x128xf32>
    %42 = vector.multi_reduction <add>, %41, %cst_19 [1] : vector<1x4x128xf32> to vector<1x128xf32>
    %43 = vector.shape_cast %42 : vector<1x128xf32> to vector<1x1x128xf32>
    %44 = vector.shape_cast %40 : vector<1x128xf32> to vector<1x1x128xf32>
    %45 = arith.subf %44, %43 : vector<1x1x128xf32>
    %cst_20 = arith.constant 0.000000e+00 : f32
    %46 = vector.broadcast %cst_20 : f32 to vector<1x1x128xf32>
    %47 = arith.cmpf oge, %45, %46 : vector<1x1x128xf32>
    %48 = vector.broadcast %1 : f32 to vector<1x1x128xf32>
    %49 = vector.broadcast %2 : f32 to vector<1x1x128xf32>
    %50 = arith.select %47, %48, %49 : vector<1x1x128xi1>, vector<1x1x128xf32>
    %51 = arith.mulf %50, %45 : vector<1x1x128xf32>
    %52 = vector.broadcast %51 : vector<1x1x128xf32> to vector<1x4x128xf32>
    %53 = arith.mulf %38, %52 : vector<1x4x128xf32>
    %54 = arith.addf %27, %53 : vector<1x4x128xf32>
    %55 = vector.broadcast %3 : f32 to vector<1x4x128xf32>
    %56 = arith.mulf %55, %54 : vector<1x4x128xf32>
    %c1_i32_21 = arith.constant 1 : i32
    %57 = arith.addi %c1_i32_15, %c1_i32_21 : i32
    %58 = arith.index_cast %57 : i32 to index
    %c0_22 = arith.constant 0 : index
    %c0_23 = arith.constant 0 : index
    %59 = vector.load %arg4[%58, %c0_22, %c0_23] : memref<16x4x128xf32, #tpu.memory_space<vmem>>, vector<1x4x128xf32>
    %60 = arith.addf %56, %59 : vector<1x4x128xf32>
    %c1_i32_24 = arith.constant 1 : i32
    %61 = arith.addi %c1_i32_15, %c1_i32_24 : i32
    %62 = arith.index_cast %61 : i32 to index
    %c0_25 = arith.constant 0 : index
    %c0_26 = arith.constant 0 : index
    %63 = vector.load %arg5[%62, %c0_25, %c0_26] : memref<16x4x128xf32, #tpu.memory_space<vmem>>, vector<1x4x128xf32>
    tpu.vector_store %arg5[%62, %c0_25, %c0_26], %60 {strides = array<i32>} : memref<16x4x128xf32, #tpu.memory_space<vmem>>, vector<1x4x128xf32>,
    %c2_i32 = arith.constant 2 : i32
    %64 = arith.index_cast %c2_i32 : i32 to index
    %c0_27 = arith.constant 0 : index
    %c0_28 = arith.constant 0 : index
    %65 = vector.load %arg2[%64, %c0_27, %c0_28] : memref<16x4x128xf32, #tpu.memory_space<vmem>>, vector<1x4x128xf32>
    %66 = arith.index_cast %c2_i32 : i32 to index
    %c0_29 = arith.constant 0 : index
    %67 = vector.load %arg3[%66, %c0_29] : memref<16x128xf32, #tpu.memory_space<vmem>>, vector<1x128xf32>
    %68 = arith.mulf %54, %65 : vector<1x4x128xf32>
    %cst_30 = arith.constant dense<0.000000e+00> : vector<1x128xf32>
    %69 = vector.multi_reduction <add>, %68, %cst_30 [1] : vector<1x4x128xf32> to vector<1x128xf32>
    %70 = vector.shape_cast %69 : vector<1x128xf32> to vector<1x1x128xf32>
    %71 = vector.shape_cast %67 : vector<1x128xf32> to vector<1x1x128xf32>
    %72 = arith.subf %71, %70 : vector<1x1x128xf32>
    %cst_31 = arith.constant 0.000000e+00 : f32
    %73 = vector.broadcast %cst_31 : f32 to vector<1x1x128xf32>
    %74 = arith.cmpf oge, %72, %73 : vector<1x1x128xf32>
    %75 = vector.broadcast %1 : f32 to vector<1x1x128xf32>
    %76 = vector.broadcast %2 : f32 to vector<1x1x128xf32>
    %77 = arith.select %74, %75, %76 : vector<1x1x128xi1>, vector<1x1x128xf32>
    %78 = arith.mulf %77, %72 : vector<1x1x128xf32>
    %79 = vector.broadcast %78 : vector<1x1x128xf32> to vector<1x4x128xf32>
    %80 = arith.mulf %65, %79 : vector<1x4x128xf32>
    %81 = arith.addf %54, %80 : vector<1x4x128xf32>
    %82 = vector.broadcast %3 : f32 to vector<1x4x128xf32>
    %83 = arith.mulf %82, %81 : vector<1x4x128xf32>
    %c1_i32_32 = arith.constant 1 : i32
    %84 = arith.addi %c2_i32, %c1_i32_32 : i32
    %85 = arith.index_cast %84 : i32 to index
    %c0_33 = arith.constant 0 : index
    %c0_34 = arith.constant 0 : index
    %86 = vector.load %arg4[%85, %c0_33, %c0_34] : memref<16x4x128xf32, #tpu.memory_space<vmem>>, vector<1x4x128xf32>
    %87 = arith.addf %83, %86 : vector<1x4x128xf32>
    %c1_i32_35 = arith.constant 1 : i32
    %88 = arith.addi %c2_i32, %c1_i32_35 : i32
    %89 = arith.index_cast %88 : i32 to index
    %c0_36 = arith.constant 0 : index
    %c0_37 = arith.constant 0 : index
    %90 = vector.load %arg5[%89, %c0_36, %c0_37] : memref<16x4x128xf32, #tpu.memory_space<vmem>>, vector<1x4x128xf32>
    tpu.vector_store %arg5[%89, %c0_36, %c0_37], %87 {strides = array<i32>} : memref<16x4x128xf32, #tpu.memory_space<vmem>>, vector<1x4x128xf32>,
    %c3_i32 = arith.constant 3 : i32
    %91 = arith.index_cast %c3_i32 : i32 to index
    %c0_38 = arith.constant 0 : index
    %c0_39 = arith.constant 0 : index
    %92 = vector.load %arg2[%91, %c0_38, %c0_39] : memref<16x4x128xf32, #tpu.memory_space<vmem>>, vector<1x4x128xf32>
    %93 = arith.index_cast %c3_i32 : i32 to index
    %c0_40 = arith.constant 0 : index
    %94 = vector.load %arg3[%93, %c0_40] : memref<16x128xf32, #tpu.memory_space<vmem>>, vector<1x128xf32>
    %95 = arith.mulf %81, %92 : vector<1x4x128xf32>
    %cst_41 = arith.constant dense<0.000000e+00> : vector<1x128xf32>
    %96 = vector.multi_reduction <add>, %95, %cst_41 [1] : vector<1x4x128xf32> to vector<1x128xf32>
    %97 = vector.shape_cast %96 : vector<1x128xf32> to vector<1x1x128xf32>
    %98 = vector.shape_cast %94 : vector<1x128xf32> to vector<1x1x128xf32>
    %99 = arith.subf %98, %97 : vector<1x1x128xf32>
    %cst_42 = arith.constant 0.000000e+00 : f32
    %100 = vector.broadcast %cst_42 : f32 to vector<1x1x128xf32>
    %101 = arith.cmpf oge, %99, %100 : vector<1x1x128xf32>
    %102 = vector.broadcast %1 : f32 to vector<1x1x128xf32>
    %103 = vector.broadcast %2 : f32 to vector<1x1x128xf32>
    %104 = arith.select %101, %102, %103 : vector<1x1x128xi1>, vector<1x1x128xf32>
    %105 = arith.mulf %104, %99 : vector<1x1x128xf32>
    %106 = vector.broadcast %105 : vector<1x1x128xf32> to vector<1x4x128xf32>
    %107 = arith.mulf %92, %106 : vector<1x4x128xf32>
    %108 = arith.addf %81, %107 : vector<1x4x128xf32>
    %109 = vector.broadcast %3 : f32 to vector<1x4x128xf32>
    %110 = arith.mulf %109, %108 : vector<1x4x128xf32>
    %c1_i32_43 = arith.constant 1 : i32
    %111 = arith.addi %c3_i32, %c1_i32_43 : i32
    %112 = arith.index_cast %111 : i32 to index
    %c0_44 = arith.constant 0 : index
    %c0_45 = arith.constant 0 : index
    %113 = vector.load %arg4[%112, %c0_44, %c0_45] : memref<16x4x128xf32, #tpu.memory_space<vmem>>, vector<1x4x128xf32>
    %114 = arith.addf %110, %113 : vector<1x4x128xf32>
    %c1_i32_46 = arith.constant 1 : i32
    %115 = arith.addi %c3_i32, %c1_i32_46 : i32
    %116 = arith.index_cast %115 : i32 to index
    %c0_47 = arith.constant 0 : index
    %c0_48 = arith.constant 0 : index
    %117 = vector.load %arg5[%116, %c0_47, %c0_48] : memref<16x4x128xf32, #tpu.memory_space<vmem>>, vector<1x4x128xf32>
    tpu.vector_store %arg5[%116, %c0_47, %c0_48], %114 {strides = array<i32>} : memref<16x4x128xf32, #tpu.memory_space<vmem>>, vector<1x4x128xf32>,
    %c4_i32 = arith.constant 4 : i32
    %118 = arith.index_cast %c4_i32 : i32 to index
    %c0_49 = arith.constant 0 : index
    %c0_50 = arith.constant 0 : index
    %119 = vector.load %arg2[%118, %c0_49, %c0_50] : memref<16x4x128xf32, #tpu.memory_space<vmem>>, vector<1x4x128xf32>
    %120 = arith.index_cast %c4_i32 : i32 to index
    %c0_51 = arith.constant 0 : index
    %121 = vector.load %arg3[%120, %c0_51] : memref<16x128xf32, #tpu.memory_space<vmem>>, vector<1x128xf32>
    %122 = arith.mulf %108, %119 : vector<1x4x128xf32>
    %cst_52 = arith.constant dense<0.000000e+00> : vector<1x128xf32>
    %123 = vector.multi_reduction <add>, %122, %cst_52 [1] : vector<1x4x128xf32> to vector<1x128xf32>
    %124 = vector.shape_cast %123 : vector<1x128xf32> to vector<1x1x128xf32>
    %125 = vector.shape_cast %121 : vector<1x128xf32> to vector<1x1x128xf32>
    %126 = arith.subf %125, %124 : vector<1x1x128xf32>
    %cst_53 = arith.constant 0.000000e+00 : f32
    %127 = vector.broadcast %cst_53 : f32 to vector<1x1x128xf32>
    %128 = arith.cmpf oge, %126, %127 : vector<1x1x128xf32>
    %129 = vector.broadcast %1 : f32 to vector<1x1x128xf32>
    %130 = vector.broadcast %2 : f32 to vector<1x1x128xf32>
    %131 = arith.select %128, %129, %130 : vector<1x1x128xi1>, vector<1x1x128xf32>
    %132 = arith.mulf %131, %126 : vector<1x1x128xf32>
    %133 = vector.broadcast %132 : vector<1x1x128xf32> to vector<1x4x128xf32>
    %134 = arith.mulf %119, %133 : vector<1x4x128xf32>
    %135 = arith.addf %108, %134 : vector<1x4x128xf32>
    %136 = vector.broadcast %3 : f32 to vector<1x4x128xf32>
    %137 = arith.mulf %136, %135 : vector<1x4x128xf32>
    %c1_i32_54 = arith.constant 1 : i32
    %138 = arith.addi %c4_i32, %c1_i32_54 : i32
    %139 = arith.index_cast %138 : i32 to index
    %c0_55 = arith.constant 0 : index
    %c0_56 = arith.constant 0 : index
    %140 = vector.load %arg4[%139, %c0_55, %c0_56] : memref<16x4x128xf32, #tpu.memory_space<vmem>>, vector<1x4x128xf32>
    %141 = arith.addf %137, %140 : vector<1x4x128xf32>
    %c1_i32_57 = arith.constant 1 : i32
    %142 = arith.addi %c4_i32, %c1_i32_57 : i32
    %143 = arith.index_cast %142 : i32 to index
    %c0_58 = arith.constant 0 : index
    %c0_59 = arith.constant 0 : index
    %144 = vector.load %arg5[%143, %c0_58, %c0_59] : memref<16x4x128xf32, #tpu.memory_space<vmem>>, vector<1x4x128xf32>
    tpu.vector_store %arg5[%143, %c0_58, %c0_59], %141 {strides = array<i32>} : memref<16x4x128xf32, #tpu.memory_space<vmem>>, vector<1x4x128xf32>,
    %c5_i32 = arith.constant 5 : i32
    %145 = arith.index_cast %c5_i32 : i32 to index
    %c0_60 = arith.constant 0 : index
    %c0_61 = arith.constant 0 : index
    %146 = vector.load %arg2[%145, %c0_60, %c0_61] : memref<16x4x128xf32, #tpu.memory_space<vmem>>, vector<1x4x128xf32>
    %147 = arith.index_cast %c5_i32 : i32 to index
    %c0_62 = arith.constant 0 : index
    %148 = vector.load %arg3[%147, %c0_62] : memref<16x128xf32, #tpu.memory_space<vmem>>, vector<1x128xf32>
    %149 = arith.mulf %135, %146 : vector<1x4x128xf32>
    %cst_63 = arith.constant dense<0.000000e+00> : vector<1x128xf32>
    %150 = vector.multi_reduction <add>, %149, %cst_63 [1] : vector<1x4x128xf32> to vector<1x128xf32>
    %151 = vector.shape_cast %150 : vector<1x128xf32> to vector<1x1x128xf32>
    %152 = vector.shape_cast %148 : vector<1x128xf32> to vector<1x1x128xf32>
    %153 = arith.subf %152, %151 : vector<1x1x128xf32>
    %cst_64 = arith.constant 0.000000e+00 : f32
    %154 = vector.broadcast %cst_64 : f32 to vector<1x1x128xf32>
    %155 = arith.cmpf oge, %153, %154 : vector<1x1x128xf32>
    %156 = vector.broadcast %1 : f32 to vector<1x1x128xf32>
    %157 = vector.broadcast %2 : f32 to vector<1x1x128xf32>
    %158 = arith.select %155, %156, %157 : vector<1x1x128xi1>, vector<1x1x128xf32>
    %159 = arith.mulf %158, %153 : vector<1x1x128xf32>
    %160 = vector.broadcast %159 : vector<1x1x128xf32> to vector<1x4x128xf32>
    %161 = arith.mulf %146, %160 : vector<1x4x128xf32>
    %162 = arith.addf %135, %161 : vector<1x4x128xf32>
    %163 = vector.broadcast %3 : f32 to vector<1x4x128xf32>
    %164 = arith.mulf %163, %162 : vector<1x4x128xf32>
    %c1_i32_65 = arith.constant 1 : i32
    %165 = arith.addi %c5_i32, %c1_i32_65 : i32
    %166 = arith.index_cast %165 : i32 to index
    %c0_66 = arith.constant 0 : index
    %c0_67 = arith.constant 0 : index
    %167 = vector.load %arg4[%166, %c0_66, %c0_67] : memref<16x4x128xf32, #tpu.memory_space<vmem>>, vector<1x4x128xf32>
    %168 = arith.addf %164, %167 : vector<1x4x128xf32>
    %c1_i32_68 = arith.constant 1 : i32
    %169 = arith.addi %c5_i32, %c1_i32_68 : i32
    %170 = arith.index_cast %169 : i32 to index
    %c0_69 = arith.constant 0 : index
    %c0_70 = arith.constant 0 : index
    %171 = vector.load %arg5[%170, %c0_69, %c0_70] : memref<16x4x128xf32, #tpu.memory_space<vmem>>, vector<1x4x128xf32>
    tpu.vector_store %arg5[%170, %c0_69, %c0_70], %168 {strides = array<i32>} : memref<16x4x128xf32, #tpu.memory_space<vmem>>, vector<1x4x128xf32>,
    %c6_i32 = arith.constant 6 : i32
    %172 = arith.index_cast %c6_i32 : i32 to index
    %c0_71 = arith.constant 0 : index
    %c0_72 = arith.constant 0 : index
    %173 = vector.load %arg2[%172, %c0_71, %c0_72] : memref<16x4x128xf32, #tpu.memory_space<vmem>>, vector<1x4x128xf32>
    %174 = arith.index_cast %c6_i32 : i32 to index
    %c0_73 = arith.constant 0 : index
    %175 = vector.load %arg3[%174, %c0_73] : memref<16x128xf32, #tpu.memory_space<vmem>>, vector<1x128xf32>
    %176 = arith.mulf %162, %173 : vector<1x4x128xf32>
    %cst_74 = arith.constant dense<0.000000e+00> : vector<1x128xf32>
    %177 = vector.multi_reduction <add>, %176, %cst_74 [1] : vector<1x4x128xf32> to vector<1x128xf32>
    %178 = vector.shape_cast %177 : vector<1x128xf32> to vector<1x1x128xf32>
    %179 = vector.shape_cast %175 : vector<1x128xf32> to vector<1x1x128xf32>
    %180 = arith.subf %179, %178 : vector<1x1x128xf32>
    %cst_75 = arith.constant 0.000000e+00 : f32
    %181 = vector.broadcast %cst_75 : f32 to vector<1x1x128xf32>
    %182 = arith.cmpf oge, %180, %181 : vector<1x1x128xf32>
    %183 = vector.broadcast %1 : f32 to vector<1x1x128xf32>
    %184 = vector.broadcast %2 : f32 to vector<1x1x128xf32>
    %185 = arith.select %182, %183, %184 : vector<1x1x128xi1>, vector<1x1x128xf32>
    %186 = arith.mulf %185, %180 : vector<1x1x128xf32>
    %187 = vector.broadcast %186 : vector<1x1x128xf32> to vector<1x4x128xf32>
    %188 = arith.mulf %173, %187 : vector<1x4x128xf32>
    %189 = arith.addf %162, %188 : vector<1x4x128xf32>
    %190 = vector.broadcast %3 : f32 to vector<1x4x128xf32>
    %191 = arith.mulf %190, %189 : vector<1x4x128xf32>
    %c1_i32_76 = arith.constant 1 : i32
    %192 = arith.addi %c6_i32, %c1_i32_76 : i32
    %193 = arith.index_cast %192 : i32 to index
    %c0_77 = arith.constant 0 : index
    %c0_78 = arith.constant 0 : index
    %194 = vector.load %arg4[%193, %c0_77, %c0_78] : memref<16x4x128xf32, #tpu.memory_space<vmem>>, vector<1x4x128xf32>
    %195 = arith.addf %191, %194 : vector<1x4x128xf32>
    %c1_i32_79 = arith.constant 1 : i32
    %196 = arith.addi %c6_i32, %c1_i32_79 : i32
    %197 = arith.index_cast %196 : i32 to index
    %c0_80 = arith.constant 0 : index
    %c0_81 = arith.constant 0 : index
    %198 = vector.load %arg5[%197, %c0_80, %c0_81] : memref<16x4x128xf32, #tpu.memory_space<vmem>>, vector<1x4x128xf32>
    tpu.vector_store %arg5[%197, %c0_80, %c0_81], %195 {strides = array<i32>} : memref<16x4x128xf32, #tpu.memory_space<vmem>>, vector<1x4x128xf32>,
    %c7_i32 = arith.constant 7 : i32
    %199 = arith.index_cast %c7_i32 : i32 to index
    %c0_82 = arith.constant 0 : index
    %c0_83 = arith.constant 0 : index
    %200 = vector.load %arg2[%199, %c0_82, %c0_83] : memref<16x4x128xf32, #tpu.memory_space<vmem>>, vector<1x4x128xf32>
    %201 = arith.index_cast %c7_i32 : i32 to index
    %c0_84 = arith.constant 0 : index
    %202 = vector.load %arg3[%201, %c0_84] : memref<16x128xf32, #tpu.memory_space<vmem>>, vector<1x128xf32>
    %203 = arith.mulf %189, %200 : vector<1x4x128xf32>
    %cst_85 = arith.constant dense<0.000000e+00> : vector<1x128xf32>
    %204 = vector.multi_reduction <add>, %203, %cst_85 [1] : vector<1x4x128xf32> to vector<1x128xf32>
    %205 = vector.shape_cast %204 : vector<1x128xf32> to vector<1x1x128xf32>
    %206 = vector.shape_cast %202 : vector<1x128xf32> to vector<1x1x128xf32>
    %207 = arith.subf %206, %205 : vector<1x1x128xf32>
    %cst_86 = arith.constant 0.000000e+00 : f32
    %208 = vector.broadcast %cst_86 : f32 to vector<1x1x128xf32>
    %209 = arith.cmpf oge, %207, %208 : vector<1x1x128xf32>
    %210 = vector.broadcast %1 : f32 to vector<1x1x128xf32>
    %211 = vector.broadcast %2 : f32 to vector<1x1x128xf32>
    %212 = arith.select %209, %210, %211 : vector<1x1x128xi1>, vector<1x1x128xf32>
    %213 = arith.mulf %212, %207 : vector<1x1x128xf32>
    %214 = vector.broadcast %213 : vector<1x1x128xf32> to vector<1x4x128xf32>
    %215 = arith.mulf %200, %214 : vector<1x4x128xf32>
    %216 = arith.addf %189, %215 : vector<1x4x128xf32>
    %217 = vector.broadcast %3 : f32 to vector<1x4x128xf32>
    %218 = arith.mulf %217, %216 : vector<1x4x128xf32>
    %c1_i32_87 = arith.constant 1 : i32
    %219 = arith.addi %c7_i32, %c1_i32_87 : i32
    %220 = arith.index_cast %219 : i32 to index
    %c0_88 = arith.constant 0 : index
    %c0_89 = arith.constant 0 : index
    %221 = vector.load %arg4[%220, %c0_88, %c0_89] : memref<16x4x128xf32, #tpu.memory_space<vmem>>, vector<1x4x128xf32>
    %222 = arith.addf %218, %221 : vector<1x4x128xf32>
    %c1_i32_90 = arith.constant 1 : i32
    %223 = arith.addi %c7_i32, %c1_i32_90 : i32
    %224 = arith.index_cast %223 : i32 to index
    %c0_91 = arith.constant 0 : index
    %c0_92 = arith.constant 0 : index
    %225 = vector.load %arg5[%224, %c0_91, %c0_92] : memref<16x4x128xf32, #tpu.memory_space<vmem>>, vector<1x4x128xf32>
    tpu.vector_store %arg5[%224, %c0_91, %c0_92], %222 {strides = array<i32>} : memref<16x4x128xf32, #tpu.memory_space<vmem>>, vector<1x4x128xf32>,
    %c8_i32 = arith.constant 8 : i32
    %226 = arith.index_cast %c8_i32 : i32 to index
    %c0_93 = arith.constant 0 : index
    %c0_94 = arith.constant 0 : index
    %227 = vector.load %arg2[%226, %c0_93, %c0_94] : memref<16x4x128xf32, #tpu.memory_space<vmem>>, vector<1x4x128xf32>
    %228 = arith.index_cast %c8_i32 : i32 to index
    %c0_95 = arith.constant 0 : index
    %229 = vector.load %arg3[%228, %c0_95] : memref<16x128xf32, #tpu.memory_space<vmem>>, vector<1x128xf32>
    %230 = arith.mulf %216, %227 : vector<1x4x128xf32>
    %cst_96 = arith.constant dense<0.000000e+00> : vector<1x128xf32>
    %231 = vector.multi_reduction <add>, %230, %cst_96 [1] : vector<1x4x128xf32> to vector<1x128xf32>
    %232 = vector.shape_cast %231 : vector<1x128xf32> to vector<1x1x128xf32>
    %233 = vector.shape_cast %229 : vector<1x128xf32> to vector<1x1x128xf32>
    %234 = arith.subf %233, %232 : vector<1x1x128xf32>
    %cst_97 = arith.constant 0.000000e+00 : f32
    %235 = vector.broadcast %cst_97 : f32 to vector<1x1x128xf32>
    %236 = arith.cmpf oge, %234, %235 : vector<1x1x128xf32>
    %237 = vector.broadcast %1 : f32 to vector<1x1x128xf32>
    %238 = vector.broadcast %2 : f32 to vector<1x1x128xf32>
    %239 = arith.select %236, %237, %238 : vector<1x1x128xi1>, vector<1x1x128xf32>
    %240 = arith.mulf %239, %234 : vector<1x1x128xf32>
    %241 = vector.broadcast %240 : vector<1x1x128xf32> to vector<1x4x128xf32>
    %242 = arith.mulf %227, %241 : vector<1x4x128xf32>
    %243 = arith.addf %216, %242 : vector<1x4x128xf32>
    %244 = vector.broadcast %3 : f32 to vector<1x4x128xf32>
    %245 = arith.mulf %244, %243 : vector<1x4x128xf32>
    %c1_i32_98 = arith.constant 1 : i32
    %246 = arith.addi %c8_i32, %c1_i32_98 : i32
    %247 = arith.index_cast %246 : i32 to index
    %c0_99 = arith.constant 0 : index
    %c0_100 = arith.constant 0 : index
    %248 = vector.load %arg4[%247, %c0_99, %c0_100] : memref<16x4x128xf32, #tpu.memory_space<vmem>>, vector<1x4x128xf32>
    %249 = arith.addf %245, %248 : vector<1x4x128xf32>
    %c1_i32_101 = arith.constant 1 : i32
    %250 = arith.addi %c8_i32, %c1_i32_101 : i32
    %251 = arith.index_cast %250 : i32 to index
    %c0_102 = arith.constant 0 : index
    %c0_103 = arith.constant 0 : index
    %252 = vector.load %arg5[%251, %c0_102, %c0_103] : memref<16x4x128xf32, #tpu.memory_space<vmem>>, vector<1x4x128xf32>
    tpu.vector_store %arg5[%251, %c0_102, %c0_103], %249 {strides = array<i32>} : memref<16x4x128xf32, #tpu.memory_space<vmem>>, vector<1x4x128xf32>,
    %c9_i32 = arith.constant 9 : i32
    %253 = arith.index_cast %c9_i32 : i32 to index
    %c0_104 = arith.constant 0 : index
    %c0_105 = arith.constant 0 : index
    %254 = vector.load %arg2[%253, %c0_104, %c0_105] : memref<16x4x128xf32, #tpu.memory_space<vmem>>, vector<1x4x128xf32>
    %255 = arith.index_cast %c9_i32 : i32 to index
    %c0_106 = arith.constant 0 : index
    %256 = vector.load %arg3[%255, %c0_106] : memref<16x128xf32, #tpu.memory_space<vmem>>, vector<1x128xf32>
    %257 = arith.mulf %243, %254 : vector<1x4x128xf32>
    %cst_107 = arith.constant dense<0.000000e+00> : vector<1x128xf32>
    %258 = vector.multi_reduction <add>, %257, %cst_107 [1] : vector<1x4x128xf32> to vector<1x128xf32>
    %259 = vector.shape_cast %258 : vector<1x128xf32> to vector<1x1x128xf32>
    %260 = vector.shape_cast %256 : vector<1x128xf32> to vector<1x1x128xf32>
    %261 = arith.subf %260, %259 : vector<1x1x128xf32>
    %cst_108 = arith.constant 0.000000e+00 : f32
    %262 = vector.broadcast %cst_108 : f32 to vector<1x1x128xf32>
    %263 = arith.cmpf oge, %261, %262 : vector<1x1x128xf32>
    %264 = vector.broadcast %1 : f32 to vector<1x1x128xf32>
    %265 = vector.broadcast %2 : f32 to vector<1x1x128xf32>
    %266 = arith.select %263, %264, %265 : vector<1x1x128xi1>, vector<1x1x128xf32>
    %267 = arith.mulf %266, %261 : vector<1x1x128xf32>
    %268 = vector.broadcast %267 : vector<1x1x128xf32> to vector<1x4x128xf32>
    %269 = arith.mulf %254, %268 : vector<1x4x128xf32>
    %270 = arith.addf %243, %269 : vector<1x4x128xf32>
    %271 = vector.broadcast %3 : f32 to vector<1x4x128xf32>
    %272 = arith.mulf %271, %270 : vector<1x4x128xf32>
    %c1_i32_109 = arith.constant 1 : i32
    %273 = arith.addi %c9_i32, %c1_i32_109 : i32
    %274 = arith.index_cast %273 : i32 to index
    %c0_110 = arith.constant 0 : index
    %c0_111 = arith.constant 0 : index
    %275 = vector.load %arg4[%274, %c0_110, %c0_111] : memref<16x4x128xf32, #tpu.memory_space<vmem>>, vector<1x4x128xf32>
    %276 = arith.addf %272, %275 : vector<1x4x128xf32>
    %c1_i32_112 = arith.constant 1 : i32
    %277 = arith.addi %c9_i32, %c1_i32_112 : i32
    %278 = arith.index_cast %277 : i32 to index
    %c0_113 = arith.constant 0 : index
    %c0_114 = arith.constant 0 : index
    %279 = vector.load %arg5[%278, %c0_113, %c0_114] : memref<16x4x128xf32, #tpu.memory_space<vmem>>, vector<1x4x128xf32>
    tpu.vector_store %arg5[%278, %c0_113, %c0_114], %276 {strides = array<i32>} : memref<16x4x128xf32, #tpu.memory_space<vmem>>, vector<1x4x128xf32>,
    %c10_i32 = arith.constant 10 : i32
    %280 = arith.index_cast %c10_i32 : i32 to index
    %c0_115 = arith.constant 0 : index
    %c0_116 = arith.constant 0 : index
    %281 = vector.load %arg2[%280, %c0_115, %c0_116] : memref<16x4x128xf32, #tpu.memory_space<vmem>>, vector<1x4x128xf32>
    %282 = arith.index_cast %c10_i32 : i32 to index
    %c0_117 = arith.constant 0 : index
    %283 = vector.load %arg3[%282, %c0_117] : memref<16x128xf32, #tpu.memory_space<vmem>>, vector<1x128xf32>
    %284 = arith.mulf %270, %281 : vector<1x4x128xf32>
    %cst_118 = arith.constant dense<0.000000e+00> : vector<1x128xf32>
    %285 = vector.multi_reduction <add>, %284, %cst_118 [1] : vector<1x4x128xf32> to vector<1x128xf32>
    %286 = vector.shape_cast %285 : vector<1x128xf32> to vector<1x1x128xf32>
    %287 = vector.shape_cast %283 : vector<1x128xf32> to vector<1x1x128xf32>
    %288 = arith.subf %287, %286 : vector<1x1x128xf32>
    %cst_119 = arith.constant 0.000000e+00 : f32
    %289 = vector.broadcast %cst_119 : f32 to vector<1x1x128xf32>
    %290 = arith.cmpf oge, %288, %289 : vector<1x1x128xf32>
    %291 = vector.broadcast %1 : f32 to vector<1x1x128xf32>
    %292 = vector.broadcast %2 : f32 to vector<1x1x128xf32>
    %293 = arith.select %290, %291, %292 : vector<1x1x128xi1>, vector<1x1x128xf32>
    %294 = arith.mulf %293, %288 : vector<1x1x128xf32>
    %295 = vector.broadcast %294 : vector<1x1x128xf32> to vector<1x4x128xf32>
    %296 = arith.mulf %281, %295 : vector<1x4x128xf32>
    %297 = arith.addf %270, %296 : vector<1x4x128xf32>
    %298 = vector.broadcast %3 : f32 to vector<1x4x128xf32>
    %299 = arith.mulf %298, %297 : vector<1x4x128xf32>
    %c1_i32_120 = arith.constant 1 : i32
    %300 = arith.addi %c10_i32, %c1_i32_120 : i32
    %301 = arith.index_cast %300 : i32 to index
    %c0_121 = arith.constant 0 : index
    %c0_122 = arith.constant 0 : index
    %302 = vector.load %arg4[%301, %c0_121, %c0_122] : memref<16x4x128xf32, #tpu.memory_space<vmem>>, vector<1x4x128xf32>
    %303 = arith.addf %299, %302 : vector<1x4x128xf32>
    %c1_i32_123 = arith.constant 1 : i32
    %304 = arith.addi %c10_i32, %c1_i32_123 : i32
    %305 = arith.index_cast %304 : i32 to index
    %c0_124 = arith.constant 0 : index
    %c0_125 = arith.constant 0 : index
    %306 = vector.load %arg5[%305, %c0_124, %c0_125] : memref<16x4x128xf32, #tpu.memory_space<vmem>>, vector<1x4x128xf32>
    tpu.vector_store %arg5[%305, %c0_124, %c0_125], %303 {strides = array<i32>} : memref<16x4x128xf32, #tpu.memory_space<vmem>>, vector<1x4x128xf32>,
    %c11_i32 = arith.constant 11 : i32
    %307 = arith.index_cast %c11_i32 : i32 to index
    %c0_126 = arith.constant 0 : index
    %c0_127 = arith.constant 0 : index
    %308 = vector.load %arg2[%307, %c0_126, %c0_127] : memref<16x4x128xf32, #tpu.memory_space<vmem>>, vector<1x4x128xf32>
    %309 = arith.index_cast %c11_i32 : i32 to index
    %c0_128 = arith.constant 0 : index
    %310 = vector.load %arg3[%309, %c0_128] : memref<16x128xf32, #tpu.memory_space<vmem>>, vector<1x128xf32>
    %311 = arith.mulf %297, %308 : vector<1x4x128xf32>
    %cst_129 = arith.constant dense<0.000000e+00> : vector<1x128xf32>
    %312 = vector.multi_reduction <add>, %311, %cst_129 [1] : vector<1x4x128xf32> to vector<1x128xf32>
    %313 = vector.shape_cast %312 : vector<1x128xf32> to vector<1x1x128xf32>
    %314 = vector.shape_cast %310 : vector<1x128xf32> to vector<1x1x128xf32>
    %315 = arith.subf %314, %313 : vector<1x1x128xf32>
    %cst_130 = arith.constant 0.000000e+00 : f32
    %316 = vector.broadcast %cst_130 : f32 to vector<1x1x128xf32>
    %317 = arith.cmpf oge, %315, %316 : vector<1x1x128xf32>
    %318 = vector.broadcast %1 : f32 to vector<1x1x128xf32>
    %319 = vector.broadcast %2 : f32 to vector<1x1x128xf32>
    %320 = arith.select %317, %318, %319 : vector<1x1x128xi1>, vector<1x1x128xf32>
    %321 = arith.mulf %320, %315 : vector<1x1x128xf32>
    %322 = vector.broadcast %321 : vector<1x1x128xf32> to vector<1x4x128xf32>
    %323 = arith.mulf %308, %322 : vector<1x4x128xf32>
    %324 = arith.addf %297, %323 : vector<1x4x128xf32>
    %325 = vector.broadcast %3 : f32 to vector<1x4x128xf32>
    %326 = arith.mulf %325, %324 : vector<1x4x128xf32>
    %c1_i32_131 = arith.constant 1 : i32
    %327 = arith.addi %c11_i32, %c1_i32_131 : i32
    %328 = arith.index_cast %327 : i32 to index
    %c0_132 = arith.constant 0 : index
    %c0_133 = arith.constant 0 : index
    %329 = vector.load %arg4[%328, %c0_132, %c0_133] : memref<16x4x128xf32, #tpu.memory_space<vmem>>, vector<1x4x128xf32>
    %330 = arith.addf %326, %329 : vector<1x4x128xf32>
    %c1_i32_134 = arith.constant 1 : i32
    %331 = arith.addi %c11_i32, %c1_i32_134 : i32
    %332 = arith.index_cast %331 : i32 to index
    %c0_135 = arith.constant 0 : index
    %c0_136 = arith.constant 0 : index
    %333 = vector.load %arg5[%332, %c0_135, %c0_136] : memref<16x4x128xf32, #tpu.memory_space<vmem>>, vector<1x4x128xf32>
    tpu.vector_store %arg5[%332, %c0_135, %c0_136], %330 {strides = array<i32>} : memref<16x4x128xf32, #tpu.memory_space<vmem>>, vector<1x4x128xf32>,
    %c12_i32 = arith.constant 12 : i32
    %334 = arith.index_cast %c12_i32 : i32 to index
    %c0_137 = arith.constant 0 : index
    %c0_138 = arith.constant 0 : index
    %335 = vector.load %arg2[%334, %c0_137, %c0_138] : memref<16x4x128xf32, #tpu.memory_space<vmem>>, vector<1x4x128xf32>
    %336 = arith.index_cast %c12_i32 : i32 to index
    %c0_139 = arith.constant 0 : index
    %337 = vector.load %arg3[%336, %c0_139] : memref<16x128xf32, #tpu.memory_space<vmem>>, vector<1x128xf32>
    %338 = arith.mulf %324, %335 : vector<1x4x128xf32>
    %cst_140 = arith.constant dense<0.000000e+00> : vector<1x128xf32>
    %339 = vector.multi_reduction <add>, %338, %cst_140 [1] : vector<1x4x128xf32> to vector<1x128xf32>
    %340 = vector.shape_cast %339 : vector<1x128xf32> to vector<1x1x128xf32>
    %341 = vector.shape_cast %337 : vector<1x128xf32> to vector<1x1x128xf32>
    %342 = arith.subf %341, %340 : vector<1x1x128xf32>
    %cst_141 = arith.constant 0.000000e+00 : f32
    %343 = vector.broadcast %cst_141 : f32 to vector<1x1x128xf32>
    %344 = arith.cmpf oge, %342, %343 : vector<1x1x128xf32>
    %345 = vector.broadcast %1 : f32 to vector<1x1x128xf32>
    %346 = vector.broadcast %2 : f32 to vector<1x1x128xf32>
    %347 = arith.select %344, %345, %346 : vector<1x1x128xi1>, vector<1x1x128xf32>
    %348 = arith.mulf %347, %342 : vector<1x1x128xf32>
    %349 = vector.broadcast %348 : vector<1x1x128xf32> to vector<1x4x128xf32>
    %350 = arith.mulf %335, %349 : vector<1x4x128xf32>
    %351 = arith.addf %324, %350 : vector<1x4x128xf32>
    %352 = vector.broadcast %3 : f32 to vector<1x4x128xf32>
    %353 = arith.mulf %352, %351 : vector<1x4x128xf32>
    %c1_i32_142 = arith.constant 1 : i32
    %354 = arith.addi %c12_i32, %c1_i32_142 : i32
    %355 = arith.index_cast %354 : i32 to index
    %c0_143 = arith.constant 0 : index
    %c0_144 = arith.constant 0 : index
    %356 = vector.load %arg4[%355, %c0_143, %c0_144] : memref<16x4x128xf32, #tpu.memory_space<vmem>>, vector<1x4x128xf32>
    %357 = arith.addf %353, %356 : vector<1x4x128xf32>
    %c1_i32_145 = arith.constant 1 : i32
    %358 = arith.addi %c12_i32, %c1_i32_145 : i32
    %359 = arith.index_cast %358 : i32 to index
    %c0_146 = arith.constant 0 : index
    %c0_147 = arith.constant 0 : index
    %360 = vector.load %arg5[%359, %c0_146, %c0_147] : memref<16x4x128xf32, #tpu.memory_space<vmem>>, vector<1x4x128xf32>
    tpu.vector_store %arg5[%359, %c0_146, %c0_147], %357 {strides = array<i32>} : memref<16x4x128xf32, #tpu.memory_space<vmem>>, vector<1x4x128xf32>,
    %c13_i32 = arith.constant 13 : i32
    %361 = arith.index_cast %c13_i32 : i32 to index
    %c0_148 = arith.constant 0 : index
    %c0_149 = arith.constant 0 : index
    %362 = vector.load %arg2[%361, %c0_148, %c0_149] : memref<16x4x128xf32, #tpu.memory_space<vmem>>, vector<1x4x128xf32>
    %363 = arith.index_cast %c13_i32 : i32 to index
    %c0_150 = arith.constant 0 : index
    %364 = vector.load %arg3[%363, %c0_150] : memref<16x128xf32, #tpu.memory_space<vmem>>, vector<1x128xf32>
    %365 = arith.mulf %351, %362 : vector<1x4x128xf32>
    %cst_151 = arith.constant dense<0.000000e+00> : vector<1x128xf32>
    %366 = vector.multi_reduction <add>, %365, %cst_151 [1] : vector<1x4x128xf32> to vector<1x128xf32>
    %367 = vector.shape_cast %366 : vector<1x128xf32> to vector<1x1x128xf32>
    %368 = vector.shape_cast %364 : vector<1x128xf32> to vector<1x1x128xf32>
    %369 = arith.subf %368, %367 : vector<1x1x128xf32>
    %cst_152 = arith.constant 0.000000e+00 : f32
    %370 = vector.broadcast %cst_152 : f32 to vector<1x1x128xf32>
    %371 = arith.cmpf oge, %369, %370 : vector<1x1x128xf32>
    %372 = vector.broadcast %1 : f32 to vector<1x1x128xf32>
    %373 = vector.broadcast %2 : f32 to vector<1x1x128xf32>
    %374 = arith.select %371, %372, %373 : vector<1x1x128xi1>, vector<1x1x128xf32>
    %375 = arith.mulf %374, %369 : vector<1x1x128xf32>
    %376 = vector.broadcast %375 : vector<1x1x128xf32> to vector<1x4x128xf32>
    %377 = arith.mulf %362, %376 : vector<1x4x128xf32>
    %378 = arith.addf %351, %377 : vector<1x4x128xf32>
    %379 = vector.broadcast %3 : f32 to vector<1x4x128xf32>
    %380 = arith.mulf %379, %378 : vector<1x4x128xf32>
    %c1_i32_153 = arith.constant 1 : i32
    %381 = arith.addi %c13_i32, %c1_i32_153 : i32
    %382 = arith.index_cast %381 : i32 to index
    %c0_154 = arith.constant 0 : index
    %c0_155 = arith.constant 0 : index
    %383 = vector.load %arg4[%382, %c0_154, %c0_155] : memref<16x4x128xf32, #tpu.memory_space<vmem>>, vector<1x4x128xf32>
    %384 = arith.addf %380, %383 : vector<1x4x128xf32>
    %c1_i32_156 = arith.constant 1 : i32
    %385 = arith.addi %c13_i32, %c1_i32_156 : i32
    %386 = arith.index_cast %385 : i32 to index
    %c0_157 = arith.constant 0 : index
    %c0_158 = arith.constant 0 : index
    %387 = vector.load %arg5[%386, %c0_157, %c0_158] : memref<16x4x128xf32, #tpu.memory_space<vmem>>, vector<1x4x128xf32>
    tpu.vector_store %arg5[%386, %c0_157, %c0_158], %384 {strides = array<i32>} : memref<16x4x128xf32, #tpu.memory_space<vmem>>, vector<1x4x128xf32>,
    %c14_i32 = arith.constant 14 : i32
    %388 = arith.index_cast %c14_i32 : i32 to index
    %c0_159 = arith.constant 0 : index
    %c0_160 = arith.constant 0 : index
    %389 = vector.load %arg2[%388, %c0_159, %c0_160] : memref<16x4x128xf32, #tpu.memory_space<vmem>>, vector<1x4x128xf32>
    %390 = arith.index_cast %c14_i32 : i32 to index
    %c0_161 = arith.constant 0 : index
    %391 = vector.load %arg3[%390, %c0_161] : memref<16x128xf32, #tpu.memory_space<vmem>>, vector<1x128xf32>
    %392 = arith.mulf %378, %389 : vector<1x4x128xf32>
    %cst_162 = arith.constant dense<0.000000e+00> : vector<1x128xf32>
    %393 = vector.multi_reduction <add>, %392, %cst_162 [1] : vector<1x4x128xf32> to vector<1x128xf32>
    %394 = vector.shape_cast %393 : vector<1x128xf32> to vector<1x1x128xf32>
    %395 = vector.shape_cast %391 : vector<1x128xf32> to vector<1x1x128xf32>
    %396 = arith.subf %395, %394 : vector<1x1x128xf32>
    %cst_163 = arith.constant 0.000000e+00 : f32
    %397 = vector.broadcast %cst_163 : f32 to vector<1x1x128xf32>
    %398 = arith.cmpf oge, %396, %397 : vector<1x1x128xf32>
    %399 = vector.broadcast %1 : f32 to vector<1x1x128xf32>
    %400 = vector.broadcast %2 : f32 to vector<1x1x128xf32>
    %401 = arith.select %398, %399, %400 : vector<1x1x128xi1>, vector<1x1x128xf32>
    %402 = arith.mulf %401, %396 : vector<1x1x128xf32>
    %403 = vector.broadcast %402 : vector<1x1x128xf32> to vector<1x4x128xf32>
    %404 = arith.mulf %389, %403 : vector<1x4x128xf32>
    %405 = arith.addf %378, %404 : vector<1x4x128xf32>
    %406 = vector.broadcast %3 : f32 to vector<1x4x128xf32>
    %407 = arith.mulf %406, %405 : vector<1x4x128xf32>
    %c1_i32_164 = arith.constant 1 : i32
    %408 = arith.addi %c14_i32, %c1_i32_164 : i32
    %409 = arith.index_cast %408 : i32 to index
    %c0_165 = arith.constant 0 : index
    %c0_166 = arith.constant 0 : index
    %410 = vector.load %arg4[%409, %c0_165, %c0_166] : memref<16x4x128xf32, #tpu.memory_space<vmem>>, vector<1x4x128xf32>
    %411 = arith.addf %407, %410 : vector<1x4x128xf32>
    %c1_i32_167 = arith.constant 1 : i32
    %412 = arith.addi %c14_i32, %c1_i32_167 : i32
    %413 = arith.index_cast %412 : i32 to index
    %c0_168 = arith.constant 0 : index
    %c0_169 = arith.constant 0 : index
    %414 = vector.load %arg5[%413, %c0_168, %c0_169] : memref<16x4x128xf32, #tpu.memory_space<vmem>>, vector<1x4x128xf32>
    tpu.vector_store %arg5[%413, %c0_168, %c0_169], %411 {strides = array<i32>} : memref<16x4x128xf32, #tpu.memory_space<vmem>>, vector<1x4x128xf32>,
    %c15_i32 = arith.constant 15 : i32
    return
  }
  func.func @transform_0(%arg0: i32) -> i32 {
    %c0_i32 = arith.constant 0 : i32
    %c0_i32_0 = arith.constant 0 : i32
    return %c0_i32 : i32
  }
  func.func @transform_1(%arg0: i32) -> (i32, i32, i32) {
    %c0_i32 = arith.constant 0 : i32
    %c0_i32_0 = arith.constant 0 : i32
    %c0_i32_1 = arith.constant 0 : i32
    return %c0_i32, %c0_i32_0, %arg0 : i32, i32, i32
  }
  func.func @transform_2(%arg0: i32) -> (i32, i32) {
    %c0_i32 = arith.constant 0 : i32
    %c0_i32_0 = arith.constant 0 : i32
    return %c0_i32, %arg0 : i32, i32
  }
  func.func @transform_3(%arg0: i32) -> (i32, i32, i32) {
    %c0_i32 = arith.constant 0 : i32
    %c0_i32_0 = arith.constant 0 : i32
    %c0_i32_1 = arith.constant 0 : i32
    return %c0_i32, %c0_i32_0, %arg0 : i32, i32, i32
  }
  func.func @transform_4(%arg0: i32) -> (i32, i32, i32) {
    %c0_i32 = arith.constant 0 : i32
    %c0_i32_0 = arith.constant 0 : i32
    %c0_i32_1 = arith.constant 0 : i32
    return %c0_i32, %c0_i32_0, %arg0 : i32, i32, i32
  }
}

</mosaic_0001>

<bundles_post_ra>
// kernel: tpu_custom_call.1
= control target key start
LH: loop header
LB: loop body
LE: loop exit
PB: predicated region body
PF: predicated region fallthrough
CT: control target
= control target key end

     0   :  { %9 = vsyncpa [#allocation5], 0  ;;  %s811_s0 = inlined_call_operand.hbm [shape: f32[4], index: 0, kind: input, shape index: {}]   ;;  %s812_s1 = inlined_call_operand.hbm [shape: f32[16,4,128], index: 1, kind: input, shape index: {}]   ;;  %s813_s2 = inlined_call_operand.hbm [shape: f32[16,128], index: 2, kind: input, shape index: {}]   ;;  %s814_s3 = inlined_call_operand.hbm [shape: f32[16,4,128], index: 3, kind: input, shape index: {}]   ;;  %s815_s4 = inlined_call_operand.hbm [shape: f32[16,4,128], index: 4, kind: output, shape index: {}]  }
   0x1   :  { %10 = vsyncpa [#allocation3], 0 }
   0x2   :  { %11 = vsyncpa [#allocation8], 0 }
   0x3   :  { %12 = vsyncpa [#allocation4], 0  ;;  %s624_s15 = smov [#allocation7]   ;;  %s518_s19 = scalar_lea.hbm %s813_s2, 256 }
   0x4   :  { %s38_s16 = sshll.u32 %s624_s15, 4  ;;  %p519_p0 = scmp.ne.s32.totalorder %s813_s2, %s518_s19  ;;  %s39_s16 = int_to_ptr.vmem [resolvable:$true] %s38_s16 }
   0x5   :  { %p522_p1 = scmp.lt.u32.totalorder %s518_s19, %s813_s2 }
   0x7   :  { %p524_p2 = pnand %p522_p1, %p519_p0 }
   0x9   :  { %527 = shalt.err (!%p524_p2)
}
   0xa   :  { %s528_s24 = scalar_lea.vmem %s39_s16, 256  ;;  %p533_p4 = scmp.lt.s32.totalorder %s39_s16, %s39_s16 }
   0xb   :  { %p529_p3 = scmp.ne.s32.totalorder %s39_s16, %s528_s24  ;;  %p534_p5 = scmp.lt.s32.totalorder %s528_s24, %s528_s24 }
   0xd   :  { %p535_p6 = por %p534_p5, %p533_p4 }
   0xf   :  { %p536_p7 = pnand %p535_p6, %p529_p3 }
  0x11   :  { %539 = shalt.err (!%p536_p7)
}
  0x12   :  { %s625_s25 = smov 128   ;;  %s626_s26 = smov 8  }
  0x13   :  { %44 = dma.hbm_to_vmem [thread:$0]  %s813_s2, 256, %s39_s16, [#allocation8], %s625_s25, %s625_s25, %s626_s26  }
  0x14   :  { %s540_s5 = scalar_lea.hbm %s811_s0, 16 }
  0x15   :  { %p541_p8 = scmp.ne.s32.totalorder %s811_s0, %s540_s5  ;;  %p544_p9 = scmp.lt.u32.totalorder %s540_s5, %s811_s0 }
  0x17   :  { %p546_p10 = pnand %p544_p9, %p541_p8 }
  0x19   :  { %549 = shalt.err (!%p546_p10)
}
  0x1a   :  { %s627_s10 = smov [#allocation2]   ;;  %s628_s2 = smov [#allocation6]  }
  0x1b   :  { %20 = dma.hbm_to_smem %s811_s0, 16, %s627_s10, [#allocation5]  }
  0x1c   :  { %s26_s13 = sshll.u32 %s628_s2, 4  ;;  %s550_s16 = scalar_lea.hbm %s812_s1, 1024  ;;  %s27_s13 = int_to_ptr.vmem [resolvable:$true] %s26_s13 }
  0x1d   :  { %p551_p11 = scmp.ne.s32.totalorder %s812_s1, %s550_s16  ;;  %p554_p12 = scmp.lt.u32.totalorder %s550_s16, %s812_s1 }
  0x1f   :  { %p556_p13 = pnand %p554_p12, %p551_p11 }
  0x21   :  { %559 = shalt.err (!%p556_p13)
}
  0x22   :  { %s560_s21 = scalar_lea.vmem %s27_s13, 1024  ;;  %p565_p1 = scmp.lt.s32.totalorder %s27_s13, %s27_s13 }
  0x23   :  { %p561_p0 = scmp.ne.s32.totalorder %s27_s13, %s560_s21  ;;  %p566_p2 = scmp.lt.s32.totalorder %s560_s21, %s560_s21 }
  0x25   :  { %p567_p3 = por %p566_p2, %p565_p1 }
  0x27   :  { %p568_p4 = pnand %p567_p3, %p561_p0 }
  0x29   :  { %571 = shalt.err (!%p568_p4)
}
  0x2a   :  { %s629_s0 = smov 64   ;;  %s630_s22 = smov 4  }
  0x2b   :  { %32 = dma.hbm_to_vmem [thread:$0]  %s812_s1, 1024, %s27_s13, [#allocation3], %s629_s0, %s629_s0, %s630_s22  }
  0x2c   :  { %s631_s25 = smov [#allocation9]   ;;  %s572_s29 = scalar_lea.hbm %s814_s3, 1024 }
  0x2d   :  { %s50_s26 = sshll.u32 %s631_s25, 4  ;;  %p573_p5 = scmp.ne.s32.totalorder %s814_s3, %s572_s29  ;;  %s51_s26 = int_to_ptr.vmem [resolvable:$true] %s50_s26 }
  0x2e   :  { %p576_p6 = scmp.lt.u32.totalorder %s572_s29, %s814_s3 }
  0x30   :  { %p578_p7 = pnand %p576_p6, %p573_p5 }
  0x32   :  { %581 = shalt.err (!%p578_p7)
}
  0x33   :  { %s582_s8 = scalar_lea.vmem %s51_s26, 1024  ;;  %p587_p9 = scmp.lt.s32.totalorder %s51_s26, %s51_s26 }
  0x34   :  { %p583_p8 = scmp.ne.s32.totalorder %s51_s26, %s582_s8  ;;  %p588_p10 = scmp.lt.s32.totalorder %s582_s8, %s582_s8 }
  0x36   :  { %p589_p11 = por %p588_p10, %p587_p9 }
  0x38   :  { %p590_p12 = pnand %p589_p11, %p583_p8 }
  0x3a   :  { %593 = shalt.err (!%p590_p12)
}
  0x3b   :  { %56 = dma.hbm_to_vmem [thread:$0]  %s814_s3, 1024, %s51_s26, [#allocation8], %s629_s0, %s629_s0, %s630_s22  }
  0x3c   :  { %616 = dma.done.wait [#allocation5], 16  }
  0x3d   :  { %617 = vsyncadd [#allocation5], 4294967280 }
  0x3e   :  { %618 = dma.done.wait [#allocation3], 1024  }
  0x3f   :  { %619 = vsyncadd [#allocation3], 4294966272 }
  0x40   :  { %620 = dma.done.wait [#allocation8], 1280  }
  0x41   :  { %621 = vsyncadd [#allocation8], 4294966016 }
  0x42   :  { %69 = sfence }
  0x43   :  { %s70_s10 = sld [smem:[#allocation2]]  ;;  %s508_s11 = sld [smem:[#allocation2 + $0x3]]  ;;  %v80_v0 = vld [vmem:[#allocation6] sm:$0xf]  ;;  %v77_v3 = vld [vmem:[#allocation9] sm:$0xf]  ;;  %v97_v12 = vlaneseq }
  0x44   :  { %vm83_vm0 = vcmask 1043456   ;;  %s506_s3 = sld [smem:[#allocation2 + $0x1]]  ;;  %s507_s12 = sld [smem:[#allocation2 + $0x2]]  ;;  %v81_v14 = vld [vmem:[#allocation7] sm:$0x1] }
  0x45   :  { %v98_v16 = vshrl.u32 %v97_v12, 7  ;;  %v110_v25 = vld [vmem:[#allocation6 + $0x4] sm:$0xf]  ;;  %v105_v27 = vld [vmem:[#allocation9 + $0x4] sm:$0xf]  ;;  %s632_s2 = smov [#allocation10]  }
  0x46   :  { %v111_v37 = vld [vmem:[#allocation7 + $0x1] sm:$0x1]  ;;  %v137_v44 = vld [vmem:[#allocation6 + $0x8] sm:$0xf]  ;;  %v132_v46 = vld [vmem:[#allocation9 + $0x8] sm:$0xf] }
  0x47   :  { %v720_v20 = vsub.s32 0, %v98_v16  ;;  %v138_v56 = vld [vmem:[#allocation7 + $0x2] sm:$0x1]  ;;  %v164_v63 = vld [vmem:[#allocation6 + $0xc] sm:$0xf]  ;;  %s492_s13 = sshll.u32 %s632_s2, 4  ;;  %s493_s13 = int_to_ptr.vmem [resolvable:$true] %s492_s13 }
  0x48   :  { %v165_v12 = vld [vmem:[#allocation7 + $0x3] sm:$0x1]  ;;  %s594_s14 = scalar_lea.vmem %s493_s13, 1024  ;;  %p599_p0 = scmp.lt.s32.totalorder %s493_s13, %s493_s13 }
  0x49   :  { %v74_v1 = vstv %s70_s10  ;;  %v712_v2 = vstv %s508_s11  ;;  %p595_p13 = scmp.ne.s32.totalorder %s493_s13, %s594_s14  ;;  %p600_p1 = scmp.lt.s32.totalorder %s594_s14, %s594_s14 }
  0x4a   :  { %v76_v4 = vmul.f32 %v712_v2, %v74_v1  ;;  %v82_v5 = vmul.f32 %v80_v0, %v74_v1  ;;  %v716_v18 = vstv %s506_s3  ;;  %v718_v19 = vstv %s507_s12 }
  0x4b   :  { %p601_p2 = por %p600_p1, %p599_p0 }
  0x4c   :  { %v78_v6 = vadd.f32 %v77_v3, %v76_v4  ;;  %v84_v7 = vsel %vm83_vm0, %v82_v5, 0.0 }
  0x4d   :  { %v85_v8 = vrot.slane %v84_v7, 4  ;;  %p602_p3 = pnand %p601_p2, %p595_p13 }
  0x4e   :  { %79 = vst [vmem:[#allocation10] sm:$0xf] %v78_v6 }
  0x4f   :  { %v86_v9 = vadd.f32 %v85_v8, %v84_v7 }
  0x51   :  { %v87_v10 = vrot.slane %v86_v9, 2 }
  0x53   :  { %v88_v11 = vadd.f32 %v87_v10, %v86_v9 }
  0x55   :  { %v89_v13 = vrot.slane %v88_v11, 1 }
  0x57   :  { %v90_v15 = vadd.f32 %v89_v13, %v88_v11 }
  0x59   :  { %v91_v17 = vsub.f32 %v81_v14, %v90_v15 }
  0x5b   :  { %vm92_vm1 = vcmp.ge.f32.partialorder %v91_v17, 0.0 }
  0x5c   :  { %v95_v21 = vsel %vm92_vm1, %v716_v18, %v718_v19 }
  0x5d   :  { %v96_v22 = vmul.f32 %v95_v21, %v91_v17 }
  0x5f   :  { %v100_v23 = vrot.slane %v96_v22, %v720_v20  ;;  %v191_v22 = vld [vmem:[#allocation6 + $0x10] sm:$0xf] }
  0x61   :  { %v101_v24 = vmul.f32 %v100_v23, %v80_v0 }
  0x63   :  { %v102_v26 = vadd.f32 %v101_v24, %v74_v1  ;;  %v159_v1 = vld [vmem:[#allocation9 + $0xc] sm:$0xf]  ;;  %v186_v24 = vld [vmem:[#allocation9 + $0x10] sm:$0xf] }
  0x65   :  { %v103_v28 = vmul.f32 %v102_v26, %v712_v2  ;;  %v112_v29 = vmul.f32 %v110_v25, %v102_v26 }
  0x67   :  { %v106_v30 = vadd.f32 %v105_v27, %v103_v28  ;;  %v113_v31 = vsel %vm83_vm0, %v112_v29, 0.0 }
  0x68   :  { %v114_v32 = vrot.slane %v113_v31, 4 }
  0x69   :  { %108 = vst [vmem:[#allocation10 + $0x4] sm:$0xf] %v106_v30 }
  0x6a   :  { %v115_v33 = vadd.f32 %v114_v32, %v113_v31 }
  0x6c   :  { %v116_v34 = vrot.slane %v115_v33, 2 }
  0x6e   :  { %v117_v35 = vadd.f32 %v116_v34, %v115_v33  ;;  %v192_v34 = vld [vmem:[#allocation7 + $0x4] sm:$0x1] }
  0x70   :  { %v118_v36 = vrot.slane %v117_v35, 1 }
  0x72   :  { %v119_v38 = vadd.f32 %v118_v36, %v117_v35 }
  0x74   :  { %v120_v39 = vsub.f32 %v111_v37, %v119_v38 }
  0x76   :  { %vm121_vm2 = vcmp.ge.f32.partialorder %v120_v39, 0.0 }
  0x77   :  { %v122_v40 = vsel %vm121_vm2, %v716_v18, %v718_v19 }
  0x78   :  { %v123_v41 = vmul.f32 %v122_v40, %v120_v39 }
  0x7a   :  { %v127_v42 = vrot.slane %v123_v41, %v720_v20  ;;  %v218_v41 = vld [vmem:[#allocation6 + $0x14] sm:$0xf] }
  0x7c   :  { %v128_v43 = vmul.f32 %v127_v42, %v110_v25 }
  0x7e   :  { %v129_v45 = vadd.f32 %v128_v43, %v102_v26  ;;  %v213_v43 = vld [vmem:[#allocation9 + $0x14] sm:$0xf] }
  0x80   :  { %v130_v47 = vmul.f32 %v129_v45, %v712_v2  ;;  %v139_v48 = vmul.f32 %v137_v44, %v129_v45 }
  0x82   :  { %v133_v49 = vadd.f32 %v132_v46, %v130_v47  ;;  %v140_v50 = vsel %vm83_vm0, %v139_v48, 0.0 }
  0x83   :  { %v141_v51 = vrot.slane %v140_v50, 4 }
  0x84   :  { %135 = vst [vmem:[#allocation10 + $0x8] sm:$0xf] %v133_v49 }
  0x85   :  { %v142_v52 = vadd.f32 %v141_v51, %v140_v50 }
  0x87   :  { %v143_v53 = vrot.slane %v142_v52, 2 }
  0x89   :  { %v144_v54 = vadd.f32 %v143_v53, %v142_v52  ;;  %v219_v53 = vld [vmem:[#allocation7 + $0x5] sm:$0x1] }
  0x8b   :  { %v145_v55 = vrot.slane %v144_v54, 1 }
  0x8d   :  { %v146_v57 = vadd.f32 %v145_v55, %v144_v54 }
  0x8f   :  { %v147_v58 = vsub.f32 %v138_v56, %v146_v57 }
  0x91   :  { %vm148_vm3 = vcmp.ge.f32.partialorder %v147_v58, 0.0 }
  0x92   :  { %v149_v59 = vsel %vm148_vm3, %v716_v18, %v718_v19 }
  0x93   :  { %v150_v60 = vmul.f32 %v149_v59, %v147_v58 }
  0x95   :  { %v154_v61 = vrot.slane %v150_v60, %v720_v20  ;;  %v245_v60 = vld [vmem:[#allocation6 + $0x18] sm:$0xf] }
  0x97   :  { %v155_v62 = vmul.f32 %v154_v61, %v137_v44 }
  0x99   :  { %v156_v0 = vadd.f32 %v155_v62, %v129_v45  ;;  %v240_v62 = vld [vmem:[#allocation9 + $0x18] sm:$0xf] }
  0x9b   :  { %v157_v3 = vmul.f32 %v156_v0, %v712_v2  ;;  %v166_v4 = vmul.f32 %v164_v63, %v156_v0 }
  0x9d   :  { %v160_v5 = vadd.f32 %v159_v1, %v157_v3  ;;  %v167_v6 = vsel %vm83_vm0, %v166_v4, 0.0 }
  0x9e   :  { %v168_v7 = vrot.slane %v167_v6, 4 }
  0x9f   :  { %162 = vst [vmem:[#allocation10 + $0xc] sm:$0xf] %v160_v5 }
  0xa0   :  { %v169_v8 = vadd.f32 %v168_v7, %v167_v6 }
  0xa2   :  { %v170_v9 = vrot.slane %v169_v8, 2 }
  0xa4   :  { %v171_v10 = vadd.f32 %v170_v9, %v169_v8  ;;  %v246_v9 = vld [vmem:[#allocation7 + $0x6] sm:$0x1] }
  0xa6   :  { %v172_v11 = vrot.slane %v171_v10, 1 }
  0xa8   :  { %v173_v13 = vadd.f32 %v172_v11, %v171_v10 }
  0xaa   :  { %v174_v14 = vsub.f32 %v165_v12, %v173_v13 }
  0xac   :  { %vm175_vm4 = vcmp.ge.f32.partialorder %v174_v14, 0.0 }
  0xad   :  { %v176_v15 = vsel %vm175_vm4, %v716_v18, %v718_v19 }
  0xae   :  { %v177_v16 = vmul.f32 %v176_v15, %v174_v14 }
  0xb0   :  { %v181_v17 = vrot.slane %v177_v16, %v720_v20  ;;  %v272_v16 = vld [vmem:[#allocation6 + $0x1c] sm:$0xf] }
  0xb2   :  { %v182_v21 = vmul.f32 %v181_v17, %v164_v63 }
  0xb4   :  { %v183_v23 = vadd.f32 %v182_v21, %v156_v0  ;;  %v267_v21 = vld [vmem:[#allocation9 + $0x1c] sm:$0xf] }
  0xb6   :  { %v184_v25 = vmul.f32 %v183_v23, %v712_v2  ;;  %v193_v26 = vmul.f32 %v191_v22, %v183_v23 }
  0xb8   :  { %v187_v27 = vadd.f32 %v186_v24, %v184_v25  ;;  %v194_v28 = vsel %vm83_vm0, %v193_v26, 0.0 }
  0xb9   :  { %v195_v29 = vrot.slane %v194_v28, 4 }
  0xba   :  { %189 = vst [vmem:[#allocation10 + $0x10] sm:$0xf] %v187_v27 }
  0xbb   :  { %v196_v30 = vadd.f32 %v195_v29, %v194_v28 }
  0xbd   :  { %v197_v31 = vrot.slane %v196_v30, 2 }
  0xbf   :  { %v198_v32 = vadd.f32 %v197_v31, %v196_v30  ;;  %v273_v31 = vld [vmem:[#allocation7 + $0x7] sm:$0x1] }
  0xc1   :  { %v199_v33 = vrot.slane %v198_v32, 1 }
  0xc3   :  { %v200_v35 = vadd.f32 %v199_v33, %v198_v32 }
  0xc5   :  { %v201_v36 = vsub.f32 %v192_v34, %v200_v35 }
  0xc7   :  { %vm202_vm5 = vcmp.ge.f32.partialorder %v201_v36, 0.0 }
  0xc8   :  { %v203_v37 = vsel %vm202_vm5, %v716_v18, %v718_v19 }
  0xc9   :  { %v204_v38 = vmul.f32 %v203_v37, %v201_v36 }
  0xcb   :  { %v208_v39 = vrot.slane %v204_v38, %v720_v20  ;;  %v299_v38 = vld [vmem:[#allocation6 + $0x20] sm:$0xf] }
  0xcd   :  { %v209_v40 = vmul.f32 %v208_v39, %v191_v22 }
  0xcf   :  { %v210_v42 = vadd.f32 %v209_v40, %v183_v23  ;;  %v294_v40 = vld [vmem:[#allocation9 + $0x20] sm:$0xf] }
  0xd1   :  { %v211_v44 = vmul.f32 %v210_v42, %v712_v2  ;;  %v220_v45 = vmul.f32 %v218_v41, %v210_v42 }
  0xd3   :  { %v214_v46 = vadd.f32 %v213_v43, %v211_v44  ;;  %v221_v47 = vsel %vm83_vm0, %v220_v45, 0.0 }
  0xd4   :  { %v222_v48 = vrot.slane %v221_v47, 4 }
  0xd5   :  { %216 = vst [vmem:[#allocation10 + $0x14] sm:$0xf] %v214_v46 }
  0xd6   :  { %v223_v49 = vadd.f32 %v222_v48, %v221_v47 }
  0xd8   :  { %v224_v50 = vrot.slane %v223_v49, 2 }
  0xda   :  { %v225_v51 = vadd.f32 %v224_v50, %v223_v49  ;;  %v300_v50 = vld [vmem:[#allocation7 + $0x8] sm:$0x1] }
  0xdc   :  { %v226_v52 = vrot.slane %v225_v51, 1 }
  0xde   :  { %v227_v54 = vadd.f32 %v226_v52, %v225_v51 }
  0xe0   :  { %v228_v55 = vsub.f32 %v219_v53, %v227_v54 }
  0xe2   :  { %vm229_vm6 = vcmp.ge.f32.partialorder %v228_v55, 0.0 }
  0xe3   :  { %v230_v56 = vsel %vm229_vm6, %v716_v18, %v718_v19 }
  0xe4   :  { %v231_v57 = vmul.f32 %v230_v56, %v228_v55 }
  0xe6   :  { %v235_v58 = vrot.slane %v231_v57, %v720_v20  ;;  %v326_v57 = vld [vmem:[#allocation6 + $0x24] sm:$0xf] }
  0xe8   :  { %v236_v59 = vmul.f32 %v235_v58, %v218_v41 }
  0xea   :  { %v237_v61 = vadd.f32 %v236_v59, %v210_v42  ;;  %v321_v59 = vld [vmem:[#allocation9 + $0x24] sm:$0xf] }
  0xec   :  { %v238_v63 = vmul.f32 %v237_v61, %v712_v2  ;;  %v247_v0 = vmul.f32 %v245_v60, %v237_v61 }
  0xee   :  { %v241_v1 = vadd.f32 %v240_v62, %v238_v63  ;;  %v248_v3 = vsel %vm83_vm0, %v247_v0, 0.0 }
  0xef   :  { %v249_v4 = vrot.slane %v248_v3, 4 }
  0xf0   :  { %243 = vst [vmem:[#allocation10 + $0x18] sm:$0xf] %v241_v1 }
  0xf1   :  { %v250_v5 = vadd.f32 %v249_v4, %v248_v3 }
  0xf3   :  { %v251_v6 = vrot.slane %v250_v5, 2 }
  0xf5   :  { %v252_v7 = vadd.f32 %v251_v6, %v250_v5  ;;  %v327_v6 = vld [vmem:[#allocation7 + $0x9] sm:$0x1] }
  0xf7   :  { %v253_v8 = vrot.slane %v252_v7, 1 }
  0xf9   :  { %v254_v10 = vadd.f32 %v253_v8, %v252_v7 }
  0xfb   :  { %v255_v11 = vsub.f32 %v246_v9, %v254_v10 }
  0xfd   :  { %vm256_vm7 = vcmp.ge.f32.partialorder %v255_v11, 0.0 }
  0xfe   :  { %v257_v12 = vsel %vm256_vm7, %v716_v18, %v718_v19 }
  0xff   :  { %v258_v13 = vmul.f32 %v257_v12, %v255_v11 }
 0x101   :  { %v262_v14 = vrot.slane %v258_v13, %v720_v20  ;;  %v353_v13 = vld [vmem:[#allocation6 + $0x28] sm:$0xf] }
 0x103   :  { %v263_v15 = vmul.f32 %v262_v14, %v245_v60 }
 0x105   :  { %v264_v17 = vadd.f32 %v263_v15, %v237_v61  ;;  %v348_v15 = vld [vmem:[#allocation9 + $0x28] sm:$0xf] }
 0x107   :  { %v265_v22 = vmul.f32 %v264_v17, %v712_v2  ;;  %v274_v23 = vmul.f32 %v272_v16, %v264_v17 }
 0x109   :  { %v268_v24 = vadd.f32 %v267_v21, %v265_v22  ;;  %v275_v25 = vsel %vm83_vm0, %v274_v23, 0.0 }
 0x10a   :  { %v276_v26 = vrot.slane %v275_v25, 4 }
 0x10b   :  { %270 = vst [vmem:[#allocation10 + $0x1c] sm:$0xf] %v268_v24 }
 0x10c   :  { %v277_v27 = vadd.f32 %v276_v26, %v275_v25 }
 0x10e   :  { %v278_v28 = vrot.slane %v277_v27, 2 }
 0x110   :  { %v279_v29 = vadd.f32 %v278_v28, %v277_v27  ;;  %v354_v28 = vld [vmem:[#allocation7 + $0xa] sm:$0x1] }
 0x112   :  { %v280_v30 = vrot.slane %v279_v29, 1 }
 0x114   :  { %v281_v32 = vadd.f32 %v280_v30, %v279_v29 }
 0x116   :  { %v282_v33 = vsub.f32 %v273_v31, %v281_v32 }
 0x118   :  { %vm283_vm8 = vcmp.ge.f32.partialorder %v282_v33, 0.0 }
 0x119   :  { %v284_v34 = vsel %vm283_vm8, %v716_v18, %v718_v19 }
 0x11a   :  { %v285_v35 = vmul.f32 %v284_v34, %v282_v33 }
 0x11c   :  { %v289_v36 = vrot.slane %v285_v35, %v720_v20  ;;  %v380_v35 = vld [vmem:[#allocation6 + $0x2c] sm:$0xf] }
 0x11e   :  { %v290_v37 = vmul.f32 %v289_v36, %v272_v16 }
 0x120   :  { %v291_v39 = vadd.f32 %v290_v37, %v264_v17  ;;  %v375_v37 = vld [vmem:[#allocation9 + $0x2c] sm:$0xf] }
 0x122   :  { %v292_v41 = vmul.f32 %v291_v39, %v712_v2  ;;  %v301_v42 = vmul.f32 %v299_v38, %v291_v39 }
 0x124   :  { %v295_v43 = vadd.f32 %v294_v40, %v292_v41  ;;  %v302_v44 = vsel %vm83_vm0, %v301_v42, 0.0 }
 0x125   :  { %v303_v45 = vrot.slane %v302_v44, 4 }
 0x126   :  { %297 = vst [vmem:[#allocation10 + $0x20] sm:$0xf] %v295_v43 }
 0x127   :  { %v304_v46 = vadd.f32 %v303_v45, %v302_v44 }
 0x129   :  { %v305_v47 = vrot.slane %v304_v46, 2 }
 0x12b   :  { %v306_v48 = vadd.f32 %v305_v47, %v304_v46  ;;  %v381_v47 = vld [vmem:[#allocation7 + $0xb] sm:$0x1] }
 0x12d   :  { %v307_v49 = vrot.slane %v306_v48, 1 }
 0x12f   :  { %v308_v51 = vadd.f32 %v307_v49, %v306_v48 }
 0x131   :  { %v309_v52 = vsub.f32 %v300_v50, %v308_v51 }
 0x133   :  { %vm310_vm9 = vcmp.ge.f32.partialorder %v309_v52, 0.0 }
 0x134   :  { %v311_v53 = vsel %vm310_vm9, %v716_v18, %v718_v19 }
 0x135   :  { %v312_v54 = vmul.f32 %v311_v53, %v309_v52 }
 0x137   :  { %v316_v55 = vrot.slane %v312_v54, %v720_v20  ;;  %v407_v54 = vld [vmem:[#allocation6 + $0x30] sm:$0xf] }
 0x139   :  { %v317_v56 = vmul.f32 %v316_v55, %v299_v38 }
 0x13b   :  { %v318_v58 = vadd.f32 %v317_v56, %v291_v39  ;;  %v402_v56 = vld [vmem:[#allocation9 + $0x30] sm:$0xf] }
 0x13d   :  { %v319_v60 = vmul.f32 %v318_v58, %v712_v2  ;;  %v328_v61 = vmul.f32 %v326_v57, %v318_v58 }
 0x13f   :  { %v322_v62 = vadd.f32 %v321_v59, %v319_v60  ;;  %v329_v63 = vsel %vm83_vm0, %v328_v61, 0.0 }
 0x140   :  { %v330_v0 = vrot.slane %v329_v63, 4 }
 0x141   :  { %324 = vst [vmem:[#allocation10 + $0x24] sm:$0xf] %v322_v62 }
 0x142   :  { %v331_v1 = vadd.f32 %v330_v0, %v329_v63 }
 0x144   :  { %v332_v3 = vrot.slane %v331_v1, 2 }
 0x146   :  { %v333_v4 = vadd.f32 %v332_v3, %v331_v1  ;;  %v408_v3 = vld [vmem:[#allocation7 + $0xc] sm:$0x1] }
 0x148   :  { %v334_v5 = vrot.slane %v333_v4, 1 }
 0x14a   :  { %v335_v7 = vadd.f32 %v334_v5, %v333_v4 }
 0x14c   :  { %v336_v8 = vsub.f32 %v327_v6, %v335_v7 }
 0x14e   :  { %vm337_vm10 = vcmp.ge.f32.partialorder %v336_v8, 0.0 }
 0x14f   :  { %v338_v9 = vsel %vm337_vm10, %v716_v18, %v718_v19 }
 0x150   :  { %v339_v10 = vmul.f32 %v338_v9, %v336_v8 }
 0x152   :  { %v343_v11 = vrot.slane %v339_v10, %v720_v20  ;;  %v434_v10 = vld [vmem:[#allocation6 + $0x34] sm:$0xf] }
 0x154   :  { %v344_v12 = vmul.f32 %v343_v11, %v326_v57 }
 0x156   :  { %v345_v14 = vadd.f32 %v344_v12, %v318_v58  ;;  %v429_v12 = vld [vmem:[#allocation9 + $0x34] sm:$0xf] }
 0x158   :  { %v346_v16 = vmul.f32 %v345_v14, %v712_v2  ;;  %v355_v17 = vmul.f32 %v353_v13, %v345_v14 }
 0x15a   :  { %v349_v21 = vadd.f32 %v348_v15, %v346_v16  ;;  %v356_v22 = vsel %vm83_vm0, %v355_v17, 0.0 }
 0x15b   :  { %v357_v23 = vrot.slane %v356_v22, 4 }
 0x15c   :  { %351 = vst [vmem:[#allocation10 + $0x28] sm:$0xf] %v349_v21 }
 0x15d   :  { %v358_v24 = vadd.f32 %v357_v23, %v356_v22 }
 0x15f   :  { %v359_v25 = vrot.slane %v358_v24, 2 }
 0x161   :  { %v360_v26 = vadd.f32 %v359_v25, %v358_v24  ;;  %v435_v25 = vld [vmem:[#allocation7 + $0xd] sm:$0x1] }
 0x163   :  { %v361_v27 = vrot.slane %v360_v26, 1 }
 0x165   :  { %v362_v29 = vadd.f32 %v361_v27, %v360_v26 }
 0x167   :  { %v363_v30 = vsub.f32 %v354_v28, %v362_v29 }
 0x169   :  { %vm364_vm11 = vcmp.ge.f32.partialorder %v363_v30, 0.0 }
 0x16a   :  { %v365_v31 = vsel %vm364_vm11, %v716_v18, %v718_v19 }
 0x16b   :  { %v366_v32 = vmul.f32 %v365_v31, %v363_v30 }
 0x16d   :  { %v370_v33 = vrot.slane %v366_v32, %v720_v20  ;;  %v461_v32 = vld [vmem:[#allocation6 + $0x38] sm:$0xf] }
 0x16f   :  { %v371_v34 = vmul.f32 %v370_v33, %v353_v13 }
 0x171   :  { %v372_v36 = vadd.f32 %v371_v34, %v345_v14  ;;  %v456_v34 = vld [vmem:[#allocation9 + $0x38] sm:$0xf] }
 0x173   :  { %v373_v38 = vmul.f32 %v372_v36, %v712_v2  ;;  %v382_v39 = vmul.f32 %v380_v35, %v372_v36 }
 0x175   :  { %v376_v40 = vadd.f32 %v375_v37, %v373_v38  ;;  %v383_v41 = vsel %vm83_vm0, %v382_v39, 0.0 }
 0x176   :  { %v384_v42 = vrot.slane %v383_v41, 4 }
 0x177   :  { %378 = vst [vmem:[#allocation10 + $0x2c] sm:$0xf] %v376_v40 }
 0x178   :  { %v385_v43 = vadd.f32 %v384_v42, %v383_v41 }
 0x17a   :  { %v386_v44 = vrot.slane %v385_v43, 2 }
 0x17c   :  { %v387_v45 = vadd.f32 %v386_v44, %v385_v43  ;;  %v462_v44 = vld [vmem:[#allocation7 + $0xe] sm:$0x1] }
 0x17e   :  { %v388_v46 = vrot.slane %v387_v45, 1 }
 0x180   :  { %v389_v48 = vadd.f32 %v388_v46, %v387_v45 }
 0x182   :  { %v390_v49 = vsub.f32 %v381_v47, %v389_v48 }
 0x184   :  { %vm391_vm12 = vcmp.ge.f32.partialorder %v390_v49, 0.0 }
 0x185   :  { %v392_v50 = vsel %vm391_vm12, %v716_v18, %v718_v19 }
 0x186   :  { %v393_v51 = vmul.f32 %v392_v50, %v390_v49 }
 0x188   :  { %v397_v52 = vrot.slane %v393_v51, %v720_v20 }
 0x18a   :  { %v398_v53 = vmul.f32 %v397_v52, %v380_v35  ;;  %v483_v52 = vld [vmem:[#allocation9 + $0x3c] sm:$0xf] }
 0x18c   :  { %v399_v55 = vadd.f32 %v398_v53, %v372_v36 }
 0x18e   :  { %v400_v57 = vmul.f32 %v399_v55, %v712_v2  ;;  %v409_v58 = vmul.f32 %v407_v54, %v399_v55 }
 0x190   :  { %v403_v59 = vadd.f32 %v402_v56, %v400_v57  ;;  %v410_v60 = vsel %vm83_vm0, %v409_v58, 0.0 }
 0x191   :  { %v411_v61 = vrot.slane %v410_v60, 4 }
 0x192   :  { %405 = vst [vmem:[#allocation10 + $0x30] sm:$0xf] %v403_v59 }
 0x193   :  { %v412_v62 = vadd.f32 %v411_v61, %v410_v60 }
 0x195   :  { %v413_v63 = vrot.slane %v412_v62, 2 }
 0x197   :  { %v414_v0 = vadd.f32 %v413_v63, %v412_v62 }
 0x199   :  { %v415_v1 = vrot.slane %v414_v0, 1 }
 0x19b   :  { %v416_v4 = vadd.f32 %v415_v1, %v414_v0 }
 0x19d   :  { %v417_v5 = vsub.f32 %v408_v3, %v416_v4 }
 0x19f   :  { %vm418_vm13 = vcmp.ge.f32.partialorder %v417_v5, 0.0 }
 0x1a0   :  { %v419_v6 = vsel %vm418_vm13, %v716_v18, %v718_v19 }
 0x1a1   :  { %v420_v7 = vmul.f32 %v419_v6, %v417_v5 }
 0x1a3   :  { %v424_v8 = vrot.slane %v420_v7, %v720_v20 }
 0x1a5   :  { %v425_v9 = vmul.f32 %v424_v8, %v407_v54 }
 0x1a7   :  { %v426_v11 = vadd.f32 %v425_v9, %v399_v55 }
 0x1a9   :  { %v427_v13 = vmul.f32 %v426_v11, %v712_v2  ;;  %v436_v14 = vmul.f32 %v434_v10, %v426_v11 }
 0x1ab   :  { %v430_v15 = vadd.f32 %v429_v12, %v427_v13  ;;  %v437_v16 = vsel %vm83_vm0, %v436_v14, 0.0 }
 0x1ac   :  { %v438_v17 = vrot.slane %v437_v16, 4 }
 0x1ad   :  { %432 = vst [vmem:[#allocation10 + $0x34] sm:$0xf] %v430_v15 }
 0x1ae   :  { %v439_v21 = vadd.f32 %v438_v17, %v437_v16 }
 0x1b0   :  { %v440_v22 = vrot.slane %v439_v21, 2 }
 0x1b2   :  { %v441_v23 = vadd.f32 %v440_v22, %v439_v21 }
 0x1b4   :  { %v442_v24 = vrot.slane %v441_v23, 1 }
 0x1b6   :  { %v443_v26 = vadd.f32 %v442_v24, %v441_v23 }
 0x1b8   :  { %v444_v27 = vsub.f32 %v435_v25, %v443_v26 }
 0x1ba   :  { %vm445_vm14 = vcmp.ge.f32.partialorder %v444_v27, 0.0 }
 0x1bb   :  { %v446_v28 = vsel %vm445_vm14, %v716_v18, %v718_v19 }
 0x1bc   :  { %v447_v29 = vmul.f32 %v446_v28, %v444_v27 }
 0x1be   :  { %v451_v30 = vrot.slane %v447_v29, %v720_v20 }
 0x1c0   :  { %v452_v31 = vmul.f32 %v451_v30, %v434_v10 }
 0x1c2   :  { %v453_v33 = vadd.f32 %v452_v31, %v426_v11 }
 0x1c4   :  { %v454_v35 = vmul.f32 %v453_v33, %v712_v2  ;;  %v463_v36 = vmul.f32 %v461_v32, %v453_v33 }
 0x1c6   :  { %v457_v37 = vadd.f32 %v456_v34, %v454_v35  ;;  %v464_v38 = vsel %vm83_vm0, %v463_v36, 0.0 }
 0x1c7   :  { %v465_v39 = vrot.slane %v464_v38, 4 }
 0x1c8   :  { %459 = vst [vmem:[#allocation10 + $0x38] sm:$0xf] %v457_v37 }
 0x1c9   :  { %v466_v40 = vadd.f32 %v465_v39, %v464_v38 }
 0x1cb   :  { %v467_v41 = vrot.slane %v466_v40, 2 }
 0x1cd   :  { %v468_v42 = vadd.f32 %v467_v41, %v466_v40 }
 0x1cf   :  { %v469_v43 = vrot.slane %v468_v42, 1 }
 0x1d1   :  { %v470_v45 = vadd.f32 %v469_v43, %v468_v42 }
 0x1d3   :  { %v471_v46 = vsub.f32 %v462_v44, %v470_v45 }
 0x1d5   :  { %vm472_vm15 = vcmp.ge.f32.partialorder %v471_v46, 0.0 }
 0x1d6   :  { %v473_v47 = vsel %vm472_vm15, %v716_v18, %v718_v19 }
 0x1d7   :  { %v474_v48 = vmul.f32 %v473_v47, %v471_v46 }
 0x1d9   :  { %v478_v49 = vrot.slane %v474_v48, %v720_v20 }
 0x1db   :  { %v479_v50 = vmul.f32 %v478_v49, %v461_v32 }
 0x1dd   :  { %v480_v51 = vadd.f32 %v479_v50, %v453_v33 }
 0x1df   :  { %v481_v53 = vmul.f32 %v480_v51, %v712_v2 }
 0x1e1   :  { %v484_v54 = vadd.f32 %v483_v52, %v481_v53 }
 0x1e3   :  { %486 = vst [vmem:[#allocation10 + $0x3c] sm:$0xf] %v484_v54 }
 0x1e4   :  { %605 = shalt.err (!%p602_p3)
}
 0x1e5   :  { %s606_s17 = scalar_lea.hbm %s815_s4, 1024 }
 0x1e6   :  { %p607_p4 = scmp.ne.s32.totalorder %s815_s4, %s606_s17  ;;  %p610_p5 = scmp.lt.u32.totalorder %s606_s17, %s815_s4 }
 0x1e8   :  { %p612_p6 = pnand %p610_p5, %p607_p4 }
 0x1ea   :  { %615 = shalt.err (!%p612_p6)
}
 0x1eb   :  { %498 = dma.vmem_to_hbm [thread:$0]  %s493_s13, 1024, %s815_s4, [#allocation4], %s629_s0, %s629_s0, %s630_s22  }
 0x1ec   :  { %622 = dma.done.wait [#allocation4], 1024  }
 0x1ed   :  { %623 = vsyncadd [#allocation4], 4294966272 }
 0x1ee   :  { %502 = vsyncpa [#allocation3], 1 }
 0x1ef   :  { %503 = vsyncpa [#allocation8], 1 }
 0x1f0   :  { %504 = vsyncpa [#allocation4], 1 }
 0x1f1   :  { %505 = vsyncpa [#allocation5], 1 }

</bundles_post_ra>
